<compile_context>
chip_gen: v7x
topology: tpu7x:2x2x1
jax: 0.10.0
libtpu: 0.0.40
codegen_flags: <defaults>
</compile_context>

<pallas_src>
import functools

import jax
import jax.numpy as jnp
from jax import lax
from jax.experimental import pallas as pl
from jax.experimental.pallas import tpu as pltpu


def _mha_kernel(q_ref, k_ref, v_ref, wo_ref, b_ref, out_ref,
                m_ref, l_ref, acc_ref, *, n_seq, kv_tile):
    # q_ref  : (1, H, tq, dh)  pre-scaled queries, head-major, compute dtype
    # k_ref  : (1, H, tk, dh)  keys for this KV tile
    # v_ref  : (1, H, tk, dh)  values for this KV tile
    # wo_ref : (H, dh, dim)    output-projection weights, split per head
    # b_ref  : (1, dim)        output-projection bias (f32)
    # out_ref: (1, tq, dim)
    # m_ref, l_ref : (H, tq, 1) f32  online-softmax running max / sum
    # acc_ref: (H, tq, dh) f32       unnormalized attn@V accumulator
    ki = pl.program_id(2)

    @pl.when(ki == 0)
    def _():
        m_ref[...] = jnp.full_like(m_ref, -jnp.inf)
        l_ref[...] = jnp.zeros_like(l_ref)
        acc_ref[...] = jnp.zeros_like(acc_ref)

    cdt = q_ref.dtype
    qh = q_ref[0]                      # (H, tq, dh)
    kh = k_ref[0]                      # (H, tk, dh)
    vh = v_ref[0]                      # (H, tk, dh)

    # Scores in f32 (scale already folded into the Q projection wrapper-side).
    s = jnp.einsum('hqd,hkd->hqk', qh, kh,
                   preferred_element_type=jnp.float32)   # (H, tq, tk)

    if n_seq % kv_tile != 0:
        # Static branch: only compiled when the KV tiling is ragged.  Mask the
        # out-of-range key columns and zero the padded V rows (their contents
        # are undefined).
        col = lax.broadcasted_iota(jnp.int32, s.shape, 2) + ki * kv_tile
        s = jnp.where(col < n_seq, s, -jnp.inf)
        row = lax.broadcasted_iota(jnp.int32, vh.shape, 1) + ki * kv_tile
        vh = jnp.where(row < n_seq, vh, 0).astype(cdt)

    # TODO(synk): key_padding_mask / ips branch not implemented (mask=None).

    # Online softmax update (all statistics in f32).
    m_prev = m_ref[...]
    m_new = jnp.maximum(m_prev, jnp.max(s, axis=-1, keepdims=True))
    alpha = jnp.exp(m_prev - m_new)
    p = jnp.exp(s - m_new)
    l_ref[...] = alpha * l_ref[...] + jnp.sum(p, axis=-1, keepdims=True)
    acc_ref[...] = alpha * acc_ref[...] + jnp.einsum(
        'hqk,hkd->hqd', p.astype(cdt), vh,
        preferred_element_type=jnp.float32)
    m_ref[...] = m_new

    @pl.when(ki == pl.num_programs(2) - 1)
    def _():
        # Normalize (EUP approx reciprocal), then per-head output projection
        # summed over heads, plus bias — all in f32 before the final cast.
        o = acc_ref[...] * pl.reciprocal(l_ref[...], approx=True)  # (H,tq,dh)
        proj = jnp.einsum('hqd,hdm->hqm', o.astype(cdt), wo_ref[...],
                          preferred_element_type=jnp.float32)       # (H,tq,dim)
        out = jnp.sum(proj, axis=0) + b_ref[...].astype(jnp.float32)
        out_ref[0] = out.astype(out_ref.dtype)


def attention_forward(x, w_qkv, w_out, b_out, *, heads, dim_head,
                      q_tile=None, kv_tile=None,
                      compute_dtype=jnp.bfloat16):
    """x: (B, N, dim).  Weights match nn.Linear: W_qkv (dim, 3*inner) no bias,
    W_out (inner, dim) + bias.  Returns (B, N, dim) in x.dtype."""
    B, N, dim = x.shape
    inner = heads * dim_head
    assert w_qkv.shape == (dim, 3 * inner)
    assert w_out.shape == (inner, dim)
    scale = dim_head ** (-0.5)
    cdt = compute_dtype

    # ---- Hoisted, fused QKV projection (reviewer item 1a) -------------------
    # One lane-dense matmul for Q, K and V of every head, done once (not per
    # q-tile, not per head).  `scale` is folded into the Q weights in f32
    # before the cast to the MXU compute dtype.
    w_fused = jnp.concatenate(
        [w_qkv[:, :inner] * scale, w_qkv[:, inner:]], axis=1).astype(cdt)
    qkv = jnp.einsum('bnd,de->bne', x.astype(cdt), w_fused,
                     preferred_element_type=jnp.float32)      # (B, N, 3*inner)
    qkv = qkv.reshape(B, N, 3, heads, dim_head).astype(cdt)
    q = jnp.transpose(qkv[:, :, 0], (0, 2, 1, 3))             # (B, H, N, dh)
    k = jnp.transpose(qkv[:, :, 1], (0, 2, 1, 3))
    v = jnp.transpose(qkv[:, :, 2], (0, 2, 1, 3))

    wo3 = w_out.reshape(heads, dim_head, dim).astype(cdt)     # per-head rows
    b2 = b_out.reshape(1, dim).astype(jnp.float32)

    if q_tile is None:
        q_tile = N if N <= 256 else 256
    if kv_tile is None:
        kv_tile = N if N <= 512 else 512
    n_q = pl.cdiv(N, q_tile)
    n_kv = pl.cdiv(N, kv_tile)

    # ---- Explicit VMEM budget (sized to blocks + f32 temps, with headroom) --
    bc = jnp.dtype(cdt).itemsize
    est = (2 * heads * q_tile * dim_head * bc                 # q block (x2 buf)
           + 4 * heads * kv_tile * dim_head * bc              # k + v blocks
           + 2 * (inner * dim + dim) * bc                     # w_out + bias
           + 2 * q_tile * dim * jnp.dtype(x.dtype).itemsize   # out block
           + heads * q_tile * (dim_head + 2) * 4              # acc / m / l
           + 4 * heads * q_tile * kv_tile * 4)                # f32 score temps
    vmem_limit = int(min(64 * 1024 * 1024, max(32 * 1024 * 1024, 2 * est)))

    kernel = functools.partial(_mha_kernel, n_seq=N, kv_tile=kv_tile)

    return pl.pallas_call(
        kernel,
        out_shape=jax.ShapeDtypeStruct((B, N, dim), x.dtype),
        grid_spec=pltpu.PrefetchScalarGridSpec(
            num_scalar_prefetch=0,
            grid=(B, n_q, n_kv),
            in_specs=[
                pl.BlockSpec((1, heads, q_tile, dim_head),
                             lambda b, qi, ki: (b, 0, qi, 0)),
                pl.BlockSpec((1, heads, kv_tile, dim_head),
                             lambda b, qi, ki: (b, 0, ki, 0)),
                pl.BlockSpec((1, heads, kv_tile, dim_head),
                             lambda b, qi, ki: (b, 0, ki, 0)),
                pl.BlockSpec((heads, dim_head, dim),
                             lambda b, qi, ki: (0, 0, 0)),
                pl.BlockSpec((1, dim), lambda b, qi, ki: (0, 0)),
            ],
            out_specs=pl.BlockSpec((1, q_tile, dim),
                                   lambda b, qi, ki: (b, qi, 0)),
            scratch_shapes=[
                pltpu.VMEM((heads, q_tile, 1), jnp.float32),        # m
                pltpu.VMEM((heads, q_tile, 1), jnp.float32),        # l
                pltpu.VMEM((heads, q_tile, dim_head), jnp.float32), # acc
            ],
        ),
        compiler_params=pltpu.CompilerParams(
            dimension_semantics=("parallel", "parallel", "arbitrary"),
            vmem_limit_bytes=vmem_limit),
    )(q, k, v, wo3, b2)


def attention_reference(x, w_qkv, w_out, b_out, *, heads, dim_head):
    """Pure-JAX f32 reference mirroring the PyTorch forward (mask=None path)."""
    B, N, dim = x.shape
    inner = heads * dim_head
    scale = dim_head ** (-0.5)
    qkv = x @ w_qkv                                            # (B, N, 3*inner)
    q, k, v = jnp.split(qkv, 3, axis=-1)

    def to_heads(t):
        return t.reshape(B, N, heads, dim_head).transpose(0, 2, 1, 3)

    q, k, v = map(to_heads, (q, k, v))                         # (B, h, N, d)
    sim = jnp.einsum('bhid,bhjd->bhij', q, k) * scale
    attn = jax.nn.softmax(sim, axis=-1)
    out = jnp.einsum('bhij,bhjd->bhid', attn, v)               # (B, h, N, d)
    out = out.transpose(0, 2, 1, 3).reshape(B, N, inner)
    return out @ w_out + b_out


if __name__ == "__main__":
    # Small shapes consistent with the module: dim=32, heads=8, dim_head=16.
    B, N, dim = 2, 8, 32
    heads, dim_head = 8, 16
    inner = heads * dim_head

    key = jax.random.PRNGKey(0)
    kx, kq, kw, kb = jax.random.split(key, 4)

    x = jax.random.normal(kx, (B, N, dim), dtype=jnp.float32)
    # Deterministic parameter init (Linear-like uniform scaling).
    w_qkv = jax.random.uniform(kq, (dim, 3 * inner), jnp.float32,
                               minval=-1.0, maxval=1.0) * (dim ** -0.5)
    w_out = jax.random.uniform(kw, (inner, dim), jnp.float32,
                               minval=-1.0, maxval=1.0) * (inner ** -0.5)
    b_out = jax.random.uniform(kb, (dim,), jnp.float32,
                               minval=-1.0, maxval=1.0) * (inner ** -0.5)

    out = attention_forward(x, w_qkv, w_out, b_out,
                            heads=heads, dim_head=dim_head)
    out = jax.block_until_ready(out)

    ref = attention_reference(x, w_qkv, w_out, b_out,
                              heads=heads, dim_head=dim_head)
    assert out.shape == (B, N, dim)
    # bf16 MXU operands + EUP approx reciprocal vs. an f32 reference.
    assert jnp.allclose(out, ref, atol=2e-2, rtol=2e-2), "mismatch vs reference"

    print("KERNEL_OK")
</pallas_src>

<mosaic_0001>
module attributes {stable_mosaic.version = 11 : i64} {
  func.func @_mha_kernel(%arg0: i32, %arg1: i32, %arg2: i32, %arg3: memref<1x8x8x16xbf16, #tpu.memory_space<vmem>>, %arg4: memref<1x8x8x16xbf16, #tpu.memory_space<vmem>>, %arg5: memref<1x8x8x16xbf16, #tpu.memory_space<vmem>>, %arg6: memref<8x16x32xbf16, #tpu.memory_space<vmem>>, %arg7: memref<1x32xf32, #tpu.memory_space<vmem>>, %arg8: memref<1x8x32xf32, #tpu.memory_space<vmem>>, %arg9: memref<8x8x1xf32, #tpu.memory_space<vmem>>, %arg10: memref<8x8x1xf32, #tpu.memory_space<vmem>>, %arg11: memref<8x8x16xf32, #tpu.memory_space<vmem>>) attributes {dimension_semantics = [#tpu.dimension_semantics<parallel>, #tpu.dimension_semantics<parallel>, #tpu.dimension_semantics<arbitrary>], iteration_bounds = array<i64: 2, 1, 1>, scalar_prefetch = 0 : i64, scratch_operands = 3 : i64, tpu.core_type = #tpu.core_type<tc>, window_params = [{transform_indices = @transform_0, window_bounds = array<i64: 1, 8, 8, 16>}, {transform_indices = @transform_1, window_bounds = array<i64: 1, 8, 8, 16>}, {transform_indices = @transform_2, window_bounds = array<i64: 1, 8, 8, 16>}, {pipeline_mode = #tpu.pipeline_mode<synchronous>, transform_indices = @transform_3, window_bounds = array<i64: 8, 16, 32>}, {pipeline_mode = #tpu.pipeline_mode<synchronous>, transform_indices = @transform_4, window_bounds = array<i64: 1, 32>}, {transform_indices = @transform_5, window_bounds = array<i64: 1, 8, 32>}]} {
    %c0_i32 = arith.constant 0 : i32
    %0 = arith.cmpi eq, %arg2, %c0_i32 : i32
    %1 = arith.extui %0 : i1 to i32
    %c0_i32_0 = arith.constant 0 : i32
    %2 = arith.cmpi ne, %1, %c0_i32_0 : i32
    scf.if %2 {
      %cst_35 = arith.constant 0xFF800000 : f32
      %36 = vector.broadcast %cst_35 : f32 to vector<8x8x1xf32>
      %c0_36 = arith.constant 0 : index
      %c0_37 = arith.constant 0 : index
      %c0_38 = arith.constant 0 : index
      %37 = vector.load %arg9[%c0_36, %c0_37, %c0_38] : memref<8x8x1xf32, #tpu.memory_space<vmem>>, vector<8x8x1xf32>
      tpu.vector_store %arg9[%c0_36, %c0_37, %c0_38], %36 {strides = array<i32>} : memref<8x8x1xf32, #tpu.memory_space<vmem>>, vector<8x8x1xf32>,
      %cst_39 = arith.constant 0.000000e+00 : f32
      %38 = vector.broadcast %cst_39 : f32 to vector<8x8x1xf32>
      %c0_40 = arith.constant 0 : index
      %c0_41 = arith.constant 0 : index
      %c0_42 = arith.constant 0 : index
      %39 = vector.load %arg10[%c0_40, %c0_41, %c0_42] : memref<8x8x1xf32, #tpu.memory_space<vmem>>, vector<8x8x1xf32>
      tpu.vector_store %arg10[%c0_40, %c0_41, %c0_42], %38 {strides = array<i32>} : memref<8x8x1xf32, #tpu.memory_space<vmem>>, vector<8x8x1xf32>,
      %cst_43 = arith.constant 0.000000e+00 : f32
      %40 = vector.broadcast %cst_43 : f32 to vector<8x8x16xf32>
      %c0_44 = arith.constant 0 : index
      %c0_45 = arith.constant 0 : index
      %c0_46 = arith.constant 0 : index
      %41 = vector.load %arg11[%c0_44, %c0_45, %c0_46] : memref<8x8x16xf32, #tpu.memory_space<vmem>>, vector<8x8x16xf32>
      tpu.vector_store %arg11[%c0_44, %c0_45, %c0_46], %40 {strides = array<i32>} : memref<8x8x16xf32, #tpu.memory_space<vmem>>, vector<8x8x16xf32>,
    } else {
    }
    %c0 = arith.constant 0 : index
    %c0_1 = arith.constant 0 : index
    %c0_2 = arith.constant 0 : index
    %c0_3 = arith.constant 0 : index
    %3 = vector.load %arg3[%c0, %c0_1, %c0_2, %c0_3] : memref<1x8x8x16xbf16, #tpu.memory_space<vmem>>, vector<1x8x8x16xbf16>
    %4 = vector.shape_cast %3 : vector<1x8x8x16xbf16> to vector<8x8x16xbf16>
    %c0_4 = arith.constant 0 : index
    %c0_5 = arith.constant 0 : index
    %c0_6 = arith.constant 0 : index
    %c0_7 = arith.constant 0 : index
    %5 = vector.load %arg4[%c0_4, %c0_5, %c0_6, %c0_7] : memref<1x8x8x16xbf16, #tpu.memory_space<vmem>>, vector<1x8x8x16xbf16>
    %6 = vector.shape_cast %5 : vector<1x8x8x16xbf16> to vector<8x8x16xbf16>
    %c0_8 = arith.constant 0 : index
    %c0_9 = arith.constant 0 : index
    %c0_10 = arith.constant 0 : index
    %c0_11 = arith.constant 0 : index
    %7 = vector.load %arg5[%c0_8, %c0_9, %c0_10, %c0_11] : memref<1x8x8x16xbf16, #tpu.memory_space<vmem>>, vector<1x8x8x16xbf16>
    %8 = vector.shape_cast %7 : vector<1x8x8x16xbf16> to vector<8x8x16xbf16>
    "tpu.trace_start"() <{level = 10 : i32, message = "hqd,hkd->hqk"}> : () -> ()
    %cst = arith.constant dense<0.000000e+00> : vector<8x8x8xf32>
    %9 = tpu.matmul %4, %6, %cst {dimension_numbers = #tpu.dot_dimension_numbers<[2], [2], [1], [1], [0, 0, 0, 1, 1, 1], [0], [0]>} : vector<8x8x16xbf16>, vector<8x8x16xbf16>, vector<8x8x8xf32> -> vector<8x8x8xf32>
    "tpu.trace_stop"() : () -> ()
    %c0_12 = arith.constant 0 : index
    %c0_13 = arith.constant 0 : index
    %c0_14 = arith.constant 0 : index
    %10 = vector.load %arg9[%c0_12, %c0_13, %c0_14] : memref<8x8x1xf32, #tpu.memory_space<vmem>>, vector<8x8x1xf32>
    %cst_15 = arith.constant dense<0xFF800000> : vector<8x8xf32>
    %11 = vector.multi_reduction <maximumf>, %9, %cst_15 [2] : vector<8x8x8xf32> to vector<8x8xf32>
    %12 = vector.shape_cast %11 : vector<8x8xf32> to vector<8x8x1xf32>
    %13 = arith.maximumf %10, %12 : vector<8x8x1xf32>
    %14 = arith.subf %10, %13 : vector<8x8x1xf32>
    %15 = math.exp %14 : vector<8x8x1xf32>
    %16 = vector.broadcast %13 : vector<8x8x1xf32> to vector<8x8x8xf32>
    %17 = arith.subf %9, %16 : vector<8x8x8xf32>
    %18 = math.exp %17 : vector<8x8x8xf32>
    %c0_16 = arith.constant 0 : index
    %c0_17 = arith.constant 0 : index
    %c0_18 = arith.constant 0 : index
    %19 = vector.load %arg10[%c0_16, %c0_17, %c0_18] : memref<8x8x1xf32, #tpu.memory_space<vmem>>, vector<8x8x1xf32>
    %20 = arith.mulf %15, %19 : vector<8x8x1xf32>
    %cst_19 = arith.constant dense<0.000000e+00> : vector<8x8xf32>
    %21 = vector.multi_reduction <add>, %18, %cst_19 [2] : vector<8x8x8xf32> to vector<8x8xf32>
    %22 = vector.shape_cast %21 : vector<8x8xf32> to vector<8x8x1xf32>
    %23 = arith.addf %20, %22 : vector<8x8x1xf32>
    %c0_20 = arith.constant 0 : index
    %c0_21 = arith.constant 0 : index
    %c0_22 = arith.constant 0 : index
    %24 = vector.load %arg10[%c0_20, %c0_21, %c0_22] : memref<8x8x1xf32, #tpu.memory_space<vmem>>, vector<8x8x1xf32>
    tpu.vector_store %arg10[%c0_20, %c0_21, %c0_22], %23 {strides = array<i32>} : memref<8x8x1xf32, #tpu.memory_space<vmem>>, vector<8x8x1xf32>,
    %c0_23 = arith.constant 0 : index
    %c0_24 = arith.constant 0 : index
    %c0_25 = arith.constant 0 : index
    %25 = vector.load %arg11[%c0_23, %c0_24, %c0_25] : memref<8x8x16xf32, #tpu.memory_space<vmem>>, vector<8x8x16xf32>
    %26 = vector.broadcast %15 : vector<8x8x1xf32> to vector<8x8x16xf32>
    %27 = arith.mulf %26, %25 : vector<8x8x16xf32>
    %28 = arith.truncf %18 : vector<8x8x8xf32> to vector<8x8x8xbf16>
    "tpu.trace_start"() <{level = 10 : i32, message = "hqk,hkd->hqd"}> : () -> ()
    %cst_26 = arith.constant dense<0.000000e+00> : vector<8x8x16xf32>
    %29 = tpu.matmul %28, %8, %cst_26 {dimension_numbers = #tpu.dot_dimension_numbers<[2], [1], [1], [2], [0, 0, 0, 1, 1, 2], [0], [0]>} : vector<8x8x8xbf16>, vector<8x8x16xbf16>, vector<8x8x16xf32> -> vector<8x8x16xf32>
    "tpu.trace_stop"() : () -> ()
    %30 = arith.addf %27, %29 : vector<8x8x16xf32>
    %c0_27 = arith.constant 0 : index
    %c0_28 = arith.constant 0 : index
    %c0_29 = arith.constant 0 : index
    %31 = vector.load %arg11[%c0_27, %c0_28, %c0_29] : memref<8x8x16xf32, #tpu.memory_space<vmem>>, vector<8x8x16xf32>
    tpu.vector_store %arg11[%c0_27, %c0_28, %c0_29], %30 {strides = array<i32>} : memref<8x8x16xf32, #tpu.memory_space<vmem>>, vector<8x8x16xf32>,
    %c0_30 = arith.constant 0 : index
    %c0_31 = arith.constant 0 : index
    %c0_32 = arith.constant 0 : index
    %32 = vector.load %arg9[%c0_30, %c0_31, %c0_32] : memref<8x8x1xf32, #tpu.memory_space<vmem>>, vector<8x8x1xf32>
    tpu.vector_store %arg9[%c0_30, %c0_31, %c0_32], %13 {strides = array<i32>} : memref<8x8x1xf32, #tpu.memory_space<vmem>>, vector<8x8x1xf32>,
    %c0_i32_33 = arith.constant 0 : i32
    %33 = arith.cmpi eq, %arg2, %c0_i32_33 : i32
    %34 = arith.extui %33 : i1 to i32
    %c0_i32_34 = arith.constant 0 : i32
    %35 = arith.cmpi ne, %34, %c0_i32_34 : i32
    scf.if %35 {
      %c0_35 = arith.constant 0 : index
      %c0_36 = arith.constant 0 : index
      %c0_37 = arith.constant 0 : index
      %36 = vector.load %arg11[%c0_35, %c0_36, %c0_37] : memref<8x8x16xf32, #tpu.memory_space<vmem>>, vector<8x8x16xf32>
      %c0_38 = arith.constant 0 : index
      %c0_39 = arith.constant 0 : index
      %c0_40 = arith.constant 0 : index
      %37 = vector.load %arg10[%c0_38, %c0_39, %c0_40] : memref<8x8x1xf32, #tpu.memory_space<vmem>>, vector<8x8x1xf32>
      %38 = tpu.reciprocal %37 {approx = true} : vector<8x8x1xf32> -> vector<8x8x1xf32>
      %39 = vector.broadcast %38 : vector<8x8x1xf32> to vector<8x8x16xf32>
      %40 = arith.mulf %36, %39 : vector<8x8x16xf32>
      %41 = arith.truncf %40 : vector<8x8x16xf32> to vector<8x8x16xbf16>
      %c0_41 = arith.constant 0 : index
      %c0_42 = arith.constant 0 : index
      %c0_43 = arith.constant 0 : index
      %42 = vector.load %arg6[%c0_41, %c0_42, %c0_43] : memref<8x16x32xbf16, #tpu.memory_space<vmem>>, vector<8x16x32xbf16>
      "tpu.trace_start"() <{level = 10 : i32, message = "hqd,hdm->hqm"}> : () -> ()
      %cst_44 = arith.constant dense<0.000000e+00> : vector<8x8x32xf32>
      %43 = tpu.matmul %41, %42, %cst_44 {dimension_numbers = #tpu.dot_dimension_numbers<[2], [1], [1], [2], [0, 0, 0, 1, 1, 2], [0], [0]>} : vector<8x8x16xbf16>, vector<8x16x32xbf16>, vector<8x8x32xf32> -> vector<8x8x32xf32>
      "tpu.trace_stop"() : () -> ()
      %cst_45 = arith.constant dense<0.000000e+00> : vector<8x32xf32>
      %44 = vector.multi_reduction <add>, %43, %cst_45 [0] : vector<8x8x32xf32> to vector<8x32xf32>
      %c0_46 = arith.constant 0 : index
      %c0_47 = arith.constant 0 : index
      %45 = vector.load %arg7[%c0_46, %c0_47] : memref<1x32xf32, #tpu.memory_space<vmem>>, vector<1x32xf32>
      %46 = vector.broadcast %45 : vector<1x32xf32> to vector<8x32xf32>
      %47 = arith.addf %44, %46 : vector<8x32xf32>
      %c0_48 = arith.constant 0 : index
      %c0_49 = arith.constant 0 : index
      %c0_50 = arith.constant 0 : index
      %48 = vector.load %arg8[%c0_48, %c0_49, %c0_50] : memref<1x8x32xf32, #tpu.memory_space<vmem>>, vector<1x8x32xf32>
      %49 = vector.shape_cast %48 : vector<1x8x32xf32> to vector<8x32xf32>
      %50 = vector.shape_cast %47 : vector<8x32xf32> to vector<1x8x32xf32>
      tpu.vector_store %arg8[%c0_48, %c0_49, %c0_50], %50 {strides = array<i32>} : memref<1x8x32xf32, #tpu.memory_space<vmem>>, vector<1x8x32xf32>,
    } else {
    }
    return
  }
  func.func @transform_0(%arg0: i32, %arg1: i32, %arg2: i32) -> (i32, i32, i32, i32) {
    %c0_i32 = arith.constant 0 : i32
    %c0_i32_0 = arith.constant 0 : i32
    %c0_i32_1 = arith.constant 0 : i32
    return %arg0, %c0_i32, %arg1, %c0_i32_0 : i32, i32, i32, i32
  }
  func.func @transform_1(%arg0: i32, %arg1: i32, %arg2: i32) -> (i32, i32, i32, i32) {
    %c0_i32 = arith.constant 0 : i32
    %c0_i32_0 = arith.constant 0 : i32
    %c0_i32_1 = arith.constant 0 : i32
    return %arg0, %c0_i32, %arg2, %c0_i32_0 : i32, i32, i32, i32
  }
  func.func @transform_2(%arg0: i32, %arg1: i32, %arg2: i32) -> (i32, i32, i32, i32) {
    %c0_i32 = arith.constant 0 : i32
    %c0_i32_0 = arith.constant 0 : i32
    %c0_i32_1 = arith.constant 0 : i32
    return %arg0, %c0_i32, %arg2, %c0_i32_0 : i32, i32, i32, i32
  }
  func.func @transform_3(%arg0: i32, %arg1: i32, %arg2: i32) -> (i32, i32, i32) {
    %c0_i32 = arith.constant 0 : i32
    %c0_i32_0 = arith.constant 0 : i32
    %c0_i32_1 = arith.constant 0 : i32
    %c0_i32_2 = arith.constant 0 : i32
    return %c0_i32, %c0_i32_0, %c0_i32_1 : i32, i32, i32
  }
  func.func @transform_4(%arg0: i32, %arg1: i32, %arg2: i32) -> (i32, i32) {
    %c0_i32 = arith.constant 0 : i32
    %c0_i32_0 = arith.constant 0 : i32
    %c0_i32_1 = arith.constant 0 : i32
    return %c0_i32, %c0_i32_0 : i32, i32
  }
  func.func @transform_5(%arg0: i32, %arg1: i32, %arg2: i32) -> (i32, i32, i32) {
    %c0_i32 = arith.constant 0 : i32
    %c0_i32_0 = arith.constant 0 : i32
    return %arg0, %arg1, %c0_i32 : i32, i32, i32
  }
}

</mosaic_0001>

<bundles_post_ra>
// kernel: tpu_custom_call.1
= control target key start
LH: loop header
LB: loop body
LE: loop exit
PB: predicated region body
PF: predicated region fallthrough
CT: control target
= control target key end

     0   :  { %s3429_s0 = inlined_call_operand.hbm [shape: bf16[2,8,8,16], index: 0, kind: input, shape index: {}]   ;;  %s3430_s1 = inlined_call_operand.hbm [shape: bf16[2,8,8,16], index: 1, kind: input, shape index: {}]   ;;  %s3431_s2 = inlined_call_operand.hbm [shape: bf16[2,8,8,16], index: 2, kind: input, shape index: {}]   ;;  %s3432_s3 = inlined_call_operand.hbm [shape: bf16[8,16,32], index: 3, kind: input, shape index: {}]   ;;  %s3433_s4 = inlined_call_operand.vmem [shape: f32[1,32], index: 4, kind: input, shape index: {}]   ;;  %s3434_s5 = inlined_call_operand.hbm [shape: f32[2,8,32], index: 5, kind: output, shape index: {}]  }
   0x1   :  { %3454 = sst [smem:[#allocation23_spill]] %s3429_s0 }
   0x2   :  { %3455 = sst [smem:[#allocation24_spill]] %s3430_s1 }
   0x3   :  { %10 = vsyncpa [#allocation6], 0 }
   0x4   :  { %12 = vsyncpa [#allocation6 + $0x1], 0 }
   0x5   :  { %13 = vsyncpa [#allocation9], 0 }
   0x6   :  { %15 = vsyncpa [#allocation9 + $0x1], 0 }
   0x7   :  { %16 = vsyncpa [#allocation12], 0 }
   0x8   :  { %17 = vsyncpa [#allocation7], 0 }
   0x9   :  { %19 = vsyncpa [#allocation7 + $0x1], 0  ;;  %s2754_s18 = smov 0   ;;  %s2756_s19 = smov 0  }
   0xa   :  { %s2758_s20 = smov 0   ;;  %s2760_s21 = smov 0  }
   0xb   :  { %s2762_s22 = smov 0   ;;  %s2764_s23 = smov 0  }
   0xc LB: > { %3456 = sst [smem:[#allocation18_spill]] %s2699_s20  ;;  %s44_s24 = sadd.s32 1, %s2707_s22  ;;  %s2711_s23 = sphi %s2764_s23, %s25_s23   ;;  %s2707_s22 = sphi %s2762_s22, %s3488_s22   ;;  %s2703_s21 = sphi %s2760_s21, %s3487_s21   ;;  %s2699_s20 = sphi %s2758_s20, %s3486_s20   ;;  %s2695_s19 = sphi %s2756_s19, %s3490_s19   ;;  %s2691_s18 = sphi %s2754_s18, %s3489_s18  }
   0xd   : > { %3457 = sst [smem:[#allocation19_spill]] %s2707_s22  ;;  %s53_s25 = sadd.s32 1, %s2699_s20 }
   0xe   : > { %3458 = sst [smem:[#allocation20_spill]] %s2711_s23  ;;  %p46_p0 = scmp.ge.s32.totalorder %s44_s24, 2 }
   0xf   : > { %p3435_p1 = scmp.ne.s32.totalorder %s2699_s20, %s2695_s19  ;;  %p61_p2 = scmp.eq.s32.totalorder %s2711_s23, 0 }
  0x10   : > { %s3492_s24 = smov (%p46_p0, %s44_s24), 0  ;;  %p2387_p6 = scmp.lt.s32.totalorder %s2711_s23, 2 }
  0x11   : > { %3459 = sst [smem:[#allocation21_spill]] %s3492_s24  ;;  %p62_p3 = por %p61_p2, %p3435_p1 }
  0x12   : > { %s48_s26 = ssub.s32 %s2707_s22, %s3492_s24  ;;  %s3440_s27 = sand.u32 1, %s2699_s20  }
  0x13   : > { %p51_p5 = scmp.eq.s32.totalorder %s48_s26, 0  ;;  %s2800_s28 = sshll.u32 %s2707_s22, 9 }
  0x14   : > { %s2807_s30 = sshll.u32 %s3440_s27, 5  ;;  %p2809_p7 = pnand %p2387_p6, %p62_p3 }
  0x15   : > { %s2803_s29 = scalar_select %p51_p5, %s2699_s20, %s53_s25  }
  0x16   : > { %s3461_s6 = scalar_select %p2809_p7, 1, 0 }
  0x17   : > { %3460 = sst [smem:[#allocation22_spill]] %s2803_s29  ;;  %s254_s7 = sand.u32 1, %s2711_s23  }
  0x18   : > { %s3462_s1 = sld [smem:[#allocation24_spill]]  ;;  %s258_s11 = scalar_lea.vmem [#allocation8], %s2807_s30 }
  0x19   : > { %s266_s12 = sshll.u32 %s258_s11, 4  ;;  %s2823_s13 = scalar_lea.sflag [#allocation9], %s254_s7  ;;  %s2821_s12 = int_to_ptr.vmem [resolvable:$true] %s266_s12 }
  0x1a   : > { %p2829_p9 = pneg %p2809_p7 }
  0x1c   : > { %s3463_s15 = scalar_select %p2829_p9, 1, 0 }
  0x1e   : > { %s2818_s10 = scalar_lea.hbm %s3462_s1, %s2800_s28  ;;  %s2508_s25 = scalar_lea.hbm %s3462_s1, 1024 }
  0x1f   : > { %s2503_s14 = scalar_lea.hbm %s2818_s10, 512  ;;  %p2509_p12 = scmp.lt.u32.totalorder %s2818_s10, %s3462_s1 }
  0x20   : > { %p2504_p8 = scmp.ne.s32.totalorder %s2818_s10, %s2503_s14  ;;  %p2510_p13 = scmp.lt.u32.totalorder %s2508_s25, %s2503_s14 }
  0x21   : > { %p2512_p2 = scmp.lt.u32.totalorder %s2503_s14, %s2818_s10 }
  0x22   : > { %p2506_p10 = pnand %p2829_p9, %p2504_p8  ;;  %p2511_p0 = por %p2510_p13, %p2509_p12 }
  0x24   : > { %p2507_p11 = pneg %p2506_p10  ;;  %p2513_p3 = por %p2512_p2, %p2511_p0 }
  0x26   : > { %p2514_p5 = pnand %p2513_p3, %p2507_p11 }
  0x28   : > { %2517 = shalt.err (!%p2514_p5)
}
  0x29   : > { %s2518_s7 = scalar_lea.vmem %s2821_s12, 512  ;;  %s2713_s9 = smov [#allocation8]  }
  0x2a   : > { %p2519_p6 = scmp.ne.s32.totalorder %s2821_s12, %s2518_s7  ;;  %s2523_s11 = sshll.u32 %s2713_s9, 4  ;;  %s2524_s11 = int_to_ptr.vmem [resolvable:$false] %s2523_s11 }
  0x2b   : > { %s2525_s16 = scalar_lea.vmem %s2524_s11, 1024  ;;  %p2526_p4 = scmp.lt.s32.totalorder %s2821_s12, %s2524_s11 }
  0x2c   : > { %p2521_p8 = pnand %p2519_p6, %p2829_p9  ;;  %p2527_p1 = scmp.lt.s32.totalorder %s2525_s16, %s2518_s7 }
  0x2e   : > { %p2522_p10 = pneg %p2521_p8  ;;  %p2528_p12 = por %p2527_p1, %p2526_p4 }
  0x30   : > { %p2529_p13 = pnand %p2528_p12, %p2522_p10 }
  0x32   : > { %2532 = shalt.err (!%p2529_p13)
}
  0x33   : > { %s3436_s14 = smov 64   ;;  %s3438_s17 = smov 4  }
  0x34   : > { %2378 = dma.hbm_to_vmem [thread:$0]  (!%p2809_p7), %s2818_s10, 512, %s2821_s12, %s2823_s13, %s3436_s14, %s3436_s14, %s3438_s17  }
  0x35   : > { %s2857_s25 = sadd.s32 4294967295, %s2711_s23   ;;  %s2105_s26 = sadd.s32 4294967294, %s2711_s23  }
  0x36   : > { %p66_p1 = scmp.ne.s32.totalorder %s2695_s19, %s2691_s18  ;;  %p3445_p4 = scmp.eq.s32.totalorder %s2857_s25, 0 }
  0x37   : > { %p190_p11 = scmp.eq.s32.totalorder %s2857_s25, 1  ;;  %p196_p0 = scmp.eq.s32.totalorder %s2105_s26, 1 }
  0x38   : > { %p2106_p2 = scmp.ge.s32.totalorder %s2711_s23, 1  ;;  %p2867_p3 = por %p3445_p4, %p66_p1 }
  0x39   : > { %p3465_p5 = scmp.ne.s32.totalorder %s2699_s20, %s2695_s19  ;;  %p2878_p8 = por %p196_p0, %p66_p1 }
  0x3a   : > { %s3464_s8 = scalar_select %p2867_p3, 1, 0 }
  0x3b   : > { %p2874_p6 = por %p190_p11, %p3465_p5  ;;  %p203_p10 = scmp.lt.s32.totalorder %s2711_s23, 3 }
  0x3c   : > { %s3467_s12 = scalar_select %p2878_p8, 1, 0 }
  0x3d   : > { %s3466_s10 = scalar_select %p2874_p6, 1, 0 }
  0x3e   : > { %p2883_p12 = pnand %p2106_p2, %p203_p10  ;;  %s2716_s9 = smov [#allocation11]  }
  0x3f   : > { %s215_s11 = sshll.u32 %s2716_s9, 4  ;;  %s3469_s0 = sld [smem:[#allocation23_spill]]  ;;  %s2887_s11 = int_to_ptr.vmem [resolvable:$true] %s215_s11 }
  0x40   : > { %s3468_s7 = scalar_select %p2883_p12, 1, 0 }
  0x41   : > { %p2368_p13 = pneg %p2883_p12  ;;  %s236_s17 = scalar_lea.vmem [#allocation5], %s2807_s30 }
  0x42   : > { %s244_s27 = sshll.u32 %s236_s17, 4  ;;  %s3471_s9 = sand.u32 1, %s2699_s20   ;;  %s2904_s27 = int_to_ptr.vmem [resolvable:$true] %s244_s27 }
  0x43   : > { %p2900_p1 = pnand %p2368_p13, %p3445_p4  ;;  %s2908_s24 = scalar_lea.sflag [#allocation6], %s3471_s9 }
  0x45   : > { %s2895_s14 = scalar_lea.hbm %s3469_s0, %s2800_s28  ;;  %s2538_s29 = scalar_lea.hbm %s3469_s0, 1024 }
  0x46   : > { %s3470_s1 = scalar_select %p2900_p1, 1, 0 }
  0x47   : > { %s2533_s22 = scalar_lea.hbm %s2895_s14, 512  ;;  %p2539_p5 = scmp.lt.u32.totalorder %s2895_s14, %s3469_s0 }
  0x48   : > { %p2534_p11 = scmp.ne.s32.totalorder %s2895_s14, %s2533_s22  ;;  %p2540_p10 = scmp.lt.u32.totalorder %s2538_s29, %s2533_s22 }
  0x49   : > { %p2542_p4 = scmp.lt.u32.totalorder %s2533_s22, %s2895_s14 }
  0x4a   : > { %p2536_p0 = pnand %p2534_p11, %p2829_p9  ;;  %p2541_p13 = por %p2540_p10, %p2539_p5 }
  0x4c   : > { %p2537_p2 = pneg %p2536_p0  ;;  %p2543_p8 = por %p2542_p4, %p2541_p13 }
  0x4e   : > { %p2544_p6 = pnand %p2543_p8, %p2537_p2 }
  0x50   : > { %2547 = shalt.err (!%p2544_p6)
}
  0x51   : > { %s2548_s9 = scalar_lea.vmem %s2904_s27, 512  ;;  %s2717_s16 = smov [#allocation5]  }
  0x52   : > { %p2549_p11 = scmp.ne.s32.totalorder %s2904_s27, %s2548_s9  ;;  %s2553_s26 = sshll.u32 %s2717_s16, 4  ;;  %s2554_s26 = int_to_ptr.vmem [resolvable:$false] %s2553_s26 }
  0x53   : > { %s2555_s23 = scalar_lea.vmem %s2554_s26, 1024  ;;  %p2556_p12 = scmp.lt.s32.totalorder %s2904_s27, %s2554_s26 }
  0x54   : > { %p2551_p0 = pnand %p2549_p11, %p2829_p9  ;;  %p2557_p1 = scmp.lt.s32.totalorder %s2555_s23, %s2548_s9 }
  0x56   : > { %p2552_p3 = pneg %p2551_p0  ;;  %p2558_p5 = por %p2557_p1, %p2556_p12 }
  0x58   : > { %p2559_p10 = pnand %p2558_p5, %p2552_p3 }
  0x5a   : > { %2562 = shalt.err (!%p2559_p10)
}
  0x5b   : > { %s3472_s22 = smov 4   ;;  %s3473_s29 = smov 64  }
  0x5c   : > { %2375 = dma.hbm_to_vmem [thread:$0]  (!%p2809_p7), %s2895_s14, 512, %s2904_s27, %s2908_s24, %s3473_s29, %s3473_s29, %s3472_s22  }
  0x5d   : > { %s2563_s16 = scalar_lea.hbm %s3432_s3, 1024  ;;  %p3474_p3 = scmp.ne.s32.totalorder %s3470_s1, 0 }
  0x5e   : > { %p2564_p4 = scmp.ne.s32.totalorder %s3432_s3, %s2563_s16  ;;  %p2570_p1 = scmp.lt.u32.totalorder %s2563_s16, %s3432_s3 }
  0x5f   : > { %p2565_p6 = pneg %p3474_p3 }
  0x61   : > { %p2566_p8 = pnand %p2565_p6, %p2564_p4 }
  0x63   : > { %p2567_p12 = pneg %p2566_p8 }
  0x65   : > { %p2572_p2 = pnand %p2570_p1, %p2567_p12 }
  0x67   : > { %2575 = shalt.err (!%p2572_p2)
}
  0x68   : > { %s2576_s24 = scalar_lea.vmem %s2887_s11, 1024  ;;  %p2584_p5 = scmp.lt.s32.totalorder %s2887_s11, %s2887_s11 }
  0x69   : > { %p2577_p13 = scmp.ne.s32.totalorder %s2887_s11, %s2576_s24  ;;  %p2585_p10 = scmp.lt.s32.totalorder %s2576_s24, %s2576_s24 }
  0x6b   : > { %p2579_p11 = pnand %p2577_p13, %p2565_p6  ;;  %p2586_p7 = por %p2585_p10, %p2584_p5 }
  0x6d   : > { %p2580_p0 = pneg %p2579_p11 }
  0x6f   : > { %p2587_p9 = pnand %p2586_p7, %p2580_p0 }
  0x71   : > { %2590 = shalt.err (!%p2587_p9)
}
  0x72   : > { %2371 = dma.hbm_to_vmem [thread:$0]  (!%p3474_p3), %s3432_s3, 1024, %s2887_s11, [#allocation12], %s3473_s29, %s3473_s29, %s3472_s22  }
  0x73   : > { %s2963_s17 = scalar_lea.hbm %s3431_s2, %s2800_s28  ;;  %s280_s1 = scalar_lea.vmem [#allocation10], %s2807_s30 }
  0x74   : > { %s288_s16 = sshll.u32 %s280_s1, 4  ;;  %s2591_s26 = scalar_lea.hbm %s2963_s17, 512  ;;  %s2966_s16 = int_to_ptr.vmem [resolvable:$true] %s288_s16 }
  0x75   : > { %p2592_p7 = scmp.ne.s32.totalorder %s2963_s17, %s2591_s26  ;;  %p3475_p9 = scmp.ne.s32.totalorder %s3463_s15, 0 }
  0x76   : > { %s2596_s23 = scalar_lea.hbm %s3431_s2, 1024  ;;  %p2597_p3 = scmp.lt.u32.totalorder %s2963_s17, %s3431_s2 }
  0x77   : > { %p2594_p4 = pnand %p2592_p7, %p3475_p9  ;;  %p2598_p8 = scmp.lt.u32.totalorder %s2596_s23, %s2591_s26 }
  0x78   : > { %p2600_p1 = scmp.lt.u32.totalorder %s2591_s26, %s2963_s17 }
  0x79   : > { %p2595_p6 = pneg %p2594_p4  ;;  %p2599_p12 = por %p2598_p8, %p2597_p3 }
  0x7b   : > { %p2601_p2 = por %p2600_p1, %p2599_p12 }
  0x7d   : > { %p2602_p13 = pnand %p2601_p2, %p2595_p6 }
  0x7f   : > { %2605 = shalt.err (!%p2602_p13)
}
  0x80   : > { %s2606_s30 = scalar_lea.vmem %s2966_s16, 512  ;;  %s2718_s0 = smov [#allocation10]  }
  0x81   : > { %p2607_p11 = scmp.ne.s32.totalorder %s2966_s16, %s2606_s30  ;;  %s2611_s20 = sshll.u32 %s2718_s0, 4  ;;  %s2612_s20 = int_to_ptr.vmem [resolvable:$false] %s2611_s20 }
  0x82   : > { %s2613_s27 = scalar_lea.vmem %s2612_s20, 1024  ;;  %p2614_p10 = scmp.lt.s32.totalorder %s2966_s16, %s2612_s20 }
  0x83   : > { %p2609_p0 = pnand %p2607_p11, %p3475_p9  ;;  %p2615_p7 = scmp.lt.s32.totalorder %s2613_s27, %s2606_s30 }
  0x85   : > { %p2610_p5 = pneg %p2609_p0  ;;  %p2616_p4 = por %p2615_p7, %p2614_p10 }
  0x87   : > { %p2617_p3 = pnand %p2616_p4, %p2610_p5 }
  0x89   : > { %2620 = shalt.err (!%p2617_p3)
}
  0x8a   : > { %p3476_p6 = scmp.ne.s32.totalorder %s3461_s6, 0  ;;  %p3477_p9 = scmp.ne.s32.totalorder %s3468_s7, 0 }
  0x8b   : > { %s2996_s15 = sand.u32 (!%p3477_p9), 1, %s2695_s19   ;;  %p3478_p8 = scmp.ne.s32.totalorder (!%p3477_p9), %s3464_s8, 0 }
  0x8c   : > { %2381 = dma.hbm_to_vmem [thread:$0]  (!%p3476_p6), %s2963_s17, 512, %s2966_s16, %s2823_s13, %s3473_s29, %s3473_s29, %s3472_s22  }
  0x8d   : > { %300 = sbr.rel (%p3477_p9) target bundleno = 1220 (0x4c4), region = 40  ;;  %s2119_s14 = sshll.u32 (!%p3477_p9), %s2996_s15, 5 }
  0x8e   : > { %s303_s1 = scalar_lea.sflag (!%p3477_p9), [#allocation6], %s2996_s15  ;;  %s3000_s26 = scalar_lea.vmem (!%p3477_p9), [#allocation5], %s2119_s14 }
  0x94   : > { %2674 = dma.done.wait (%p3478_p8), %s303_s1, 512  }
  0x95   : > { %2676 = vsyncadd (%p3478_p8), %s303_s1, 4294966784  ;;  %s311_s6 = sand.u32 1, %s2857_s25   ;;  %s3007_s7 = scalar_lea.vmem [#allocation8], %s2119_s14 }
  0x96   : > { %s312_s13 = scalar_lea.sflag [#allocation9], %s311_s6 }
  0x97   : > { %2678 = dma.done.wait (%p3478_p8), %s312_s13, 1024  }
  0x98   : > { %2680 = vsyncadd (%p3478_p8), %s312_s13, 4294966272  ;;  %s3013_s22 = scalar_lea.vmem [#allocation10], %s2119_s14  ;;  %p3479_p12 = scmp.eq.s32.totalorder %s2857_s25, 0 }
  0x9a   : > { %2682 = dma.done.wait (%p3479_p12), [#allocation12], 1024   ;;  %p3480_p1 = pmov %p3479_p12 }
  0x9b   : > { %vm387_vm0 = vcmask 130048   ;;  %v2719_v0 = vmov 0.0   ;;  %vm2720_vm1 = vmmov 0   ;;  %v404_v1 = vld [vmem:[%s3007_s7] sm:$0xf]  ;;  %vm370_vm2 = vcmask 7168  }
  0x9c   : > { %2684 = vsyncadd (%p3480_p1), [#allocation12], 4294966272  ;;  %2212 = vmatprep.subr.bf16.mxu0 %v2719_v0  ;;  %388 = vst.msk [vmem:[#allocation4] sm:$0xff] %vm387_vm0, %v2719_v0  ;;  %2218 = vmatprep.subr.bf16.mxu1 %v2719_v0  ;;  %v405_v2 = vld [vmem:[%s3007_s7 + $0x4] sm:$0xf]  ;;  %v425_v3 = vsel %vm387_vm0, %v404_v1, 0 }
  0x9d   : > { %389 = vst.msk [vmem:[#allocation4 + $0x8] sm:$0xff] %vm387_vm0, %v2719_v0  ;;  %390 = vst.msk [vmem:[#allocation4 + $0x10] sm:$0xff] %vm387_vm0, %v2719_v0  ;;  %2214 = vmatprep.mubr.msk.bf16.mxu0 %vm2720_vm1, %v2719_v0  ;;  %2220 = vmatprep.mubr.msk.bf16.mxu1 %vm2720_vm1, %v2719_v0  ;;  %v471_v4 = vsel %vm387_vm0, %v405_v2, 0  ;;  %v406_v5 = vld [vmem:[%s3007_s7 + $0x8] sm:$0xf]  ;;  %v2721_v25 = vmov -inf  }
  0x9e   : > { %391 = vst.msk [vmem:[#allocation4 + $0x18] sm:$0xff] %vm387_vm0, %v2719_v0  ;;  %392 = vst.msk [vmem:[#allocation4 + $0x20] sm:$0xff] %vm387_vm0, %v2719_v0  ;;  %2213 = vmatpush3.bf16.xpose.msra.mxu0 %v425_v3  ;;  %2219 = vmatpush3.bf16.xpose.msra.mxu1 %v471_v4  ;;  %v407_v6 = vld [vmem:[%s3007_s7 + $0xc] sm:$0xf]  ;;  %v396_v7 = vld [vmem:[%s3000_s26] sm:$0xf] }
  0x9f   : > { %393 = vst.msk [vmem:[#allocation4 + $0x28] sm:$0xff] %vm387_vm0, %v2719_v0  ;;  %394 = vst.msk [vmem:[#allocation4 + $0x30] sm:$0xff] %vm387_vm0, %v2719_v0  ;;  %2224 = vmatprep.subr.bf16.mxu0 %v2719_v0  ;;  %2230 = vmatprep.subr.bf16.mxu1 %v2719_v0  ;;  %v397_v8 = vld [vmem:[%s3000_s26 + $0x4] sm:$0xf]  ;;  %v517_v9 = vsel %vm387_vm0, %v406_v5, 0  ;;  %v563_v10 = vsel %vm387_vm0, %v407_v6, 0 }
  0xa0   : > { %395 = vst.msk [vmem:[#allocation4 + $0x38] sm:$0xff] %vm387_vm0, %v2719_v0  ;;  %v408_v11 = vld [vmem:[%s3007_s7 + $0x10] sm:$0xf]  ;;  %v409_v12 = vld [vmem:[%s3007_s7 + $0x14] sm:$0xf]  ;;  %vm797_vm3 = vcmask 64512  }
  0xa1   : > { %v398_v13 = vld [vmem:[%s3000_s26 + $0x8] sm:$0xf]  ;;  %v399_v14 = vld [vmem:[%s3000_s26 + $0xc] sm:$0xf]  ;;  %v609_v15 = vsel %vm387_vm0, %v408_v11, 0  ;;  %v655_v16 = vsel %vm387_vm0, %v409_v12, 0 }
  0xa2   : > { %v410_v17 = vld [vmem:[%s3007_s7 + $0x18] sm:$0xf]  ;;  %v411_v18 = vld [vmem:[%s3007_s7 + $0x1c] sm:$0xf]  ;;  %v400_v19 = vld [vmem:[%s3000_s26 + $0x10] sm:$0xf] }
  0xa3   : > { %v401_v20 = vld [vmem:[%s3000_s26 + $0x14] sm:$0xf]  ;;  %v701_v21 = vsel %vm387_vm0, %v410_v17, 0  ;;  %v747_v22 = vsel %vm387_vm0, %v411_v18, 0  ;;  %v402_v23 = vld [vmem:[%s3000_s26 + $0x18] sm:$0xf] }
  0xa4   : > { %v403_v24 = vld [vmem:[%s3000_s26 + $0x1c] sm:$0xf]  ;;  %371 = vst.msk [vmem:[#allocation2] sm:$0xff] %vm370_vm2, %v2721_v25  ;;  %372 = vst.msk [vmem:[#allocation2 + $0x8] sm:$0xff] %vm370_vm2, %v2721_v25  ;;  %v2722_v52 = vmov 0   ;;  %vm1042_vm4 = vcmask 1043456  }
  0xa5   : > { %2215 = vmatmul.mubr.msk.bf16.vlgmr.msra.gmra.mrb[0].mxu0 %vm387_vm0, %v396_v7  ;;  %2221 = vmatmul.mubr.msk.bf16.vlgmr.msra.gmra.mrb[0].mxu1 %vm387_vm0, %v397_v8  ;;  %373 = vst.msk [vmem:[#allocation2 + $0x10] sm:$0xff] %vm370_vm2, %v2721_v25  ;;  %374 = vst.msk [vmem:[#allocation2 + $0x18] sm:$0xff] %vm370_vm2, %v2721_v25  ;;  %vm1923_vm5 = vcmask 261120   ;;  %s2123_s25 = sshll.u32 %s2996_s15, 3  ;;  %s2158_s17 = sshll.u32 %s2703_s21, 7 }
  0xa6   : > { %2225 = vmatpush3.bf16.xpose.msra.mxu0 %v517_v9  ;;  %2231 = vmatpush3.bf16.xpose.msra.mxu1 %v563_v10  ;;  %375 = vst.msk [vmem:[#allocation2 + $0x20] sm:$0xff] %vm370_vm2, %v2721_v25  ;;  %376 = vst.msk [vmem:[#allocation2 + $0x28] sm:$0xff] %vm370_vm2, %v2721_v25  ;;  %s364_s16 = scalar_lea.vmem [#allocation13], %s2123_s25  ;;  %s3379_s24 = scalar_lea.hbm %s3434_s5, %s2158_s17 }
  0xa7   : > { %2226 = vmatprep.mubr.msk.bf16.mxu0 %vm2720_vm1, %v2719_v0  ;;  %2236 = vmatprep.subr.bf16.mxu0 %v2719_v0  ;;  %377 = vst.msk [vmem:[#allocation2 + $0x30] sm:$0xff] %vm370_vm2, %v2721_v25  ;;  %378 = vst.msk [vmem:[#allocation2 + $0x38] sm:$0xff] %vm370_vm2, %v2721_v25  ;;  %s1963_s9 = sshll.u32 %s364_s16, 4  ;;  %s1949_s28 = scalar_lea.sflag [#allocation7], %s2996_s15  ;;  %s3381_s9 = int_to_ptr.vmem [resolvable:$true] %s1963_s9 }
  0xa8   : > { %2232 = vmatprep.mubr.msk.bf16.mxu1 %vm2720_vm1, %v2719_v0  ;;  %2242 = vmatprep.subr.bf16.mxu1 %v2719_v0  ;;  %379 = vst.msk [vmem:[#allocation3] sm:$0xff] %vm370_vm2, %v2719_v0  ;;  %380 = vst.msk [vmem:[#allocation3 + $0x8] sm:$0xff] %vm370_vm2, %v2719_v0  ;;  %s2621_s21 = scalar_lea.vmem %s3381_s9, 128  ;;  %p3481_p13 = scmp.ne.s32.totalorder %s3466_s10, 0 }
  0xa9   : > { %381 = vst.msk [vmem:[#allocation3 + $0x10] sm:$0xff] %vm370_vm2, %v2719_v0  ;;  %382 = vst.msk [vmem:[#allocation3 + $0x18] sm:$0xff] %vm370_vm2, %v2719_v0  ;;  %2445 = vset.pattern.permute.xlu0 %v2722_v52  ;;  %2446 = vset.pattern.permute.xlu1 %v2722_v52  ;;  %p2622_p2 = scmp.ne.s32.totalorder %s3381_s9, %s2621_s21  ;;  %s2723_s30 = smov [#allocation13]  }
  0xaa   : > { %383 = vst.msk [vmem:[#allocation3 + $0x20] sm:$0xff] %vm370_vm2, %v2719_v0  ;;  %384 = vst.msk [vmem:[#allocation3 + $0x28] sm:$0xff] %vm370_vm2, %v2719_v0  ;;  %s2625_s0 = sshll.u32 %s2723_s30, 4  ;;  %s2626_s0 = int_to_ptr.vmem [resolvable:$false] %s2625_s0 }
  0xab   : > { %385 = vst.msk [vmem:[#allocation3 + $0x30] sm:$0xff] %vm370_vm2, %v2719_v0  ;;  %386 = vst.msk [vmem:[#allocation3 + $0x38] sm:$0xff] %vm370_vm2, %v2719_v0  ;;  %v3153_v4 = vld [vmem:[#allocation2] sm:$0xff]  ;;  %v3158_v7 = vld [vmem:[#allocation2 + $0x8] sm:$0xff]  ;;  %p2623_p11 = pnand %p2622_p2, %p3481_p13  ;;  %s2627_s20 = scalar_lea.vmem %s2626_s0, 256 }
  0xac   : > { %v3168_v11 = vld [vmem:[#allocation2 + $0x10] sm:$0xff]  ;;  %p2628_p5 = scmp.lt.s32.totalorder %s3381_s9, %s2626_s0  ;;  %p2629_p10 = scmp.lt.s32.totalorder %s2627_s20, %s2621_s21 }
  0xad   : > { %2227 = vmatmul.mubr.msk.bf16.vlgmr.msra.gmra.mrb[4].mxu0 %vm387_vm0, %v398_v13  ;;  %2233 = vmatmul.mubr.msk.bf16.vlgmr.msra.gmra.mrb[4].mxu1 %vm387_vm0, %v399_v14  ;;  %p2624_p0 = pneg %p2623_p11 }
  0xae   : > { %2237 = vmatpush3.bf16.xpose.msra.mxu0 %v609_v15  ;;  %2243 = vmatpush3.bf16.xpose.msra.mxu1 %v655_v16  ;;  %v3178_v15 = vld [vmem:[#allocation2 + $0x18] sm:$0xff]  ;;  %p2630_p7 = por %p2629_p10, %p2628_p5 }
  0xaf   : > { %2238 = vmatprep.mubr.msk.bf16.mxu0 %vm2720_vm1, %v2719_v0  ;;  %2248 = vmatprep.subr.bf16.mxu0 %v2719_v0 }
  0xb0   : > { %2244 = vmatprep.mubr.msk.bf16.mxu1 %vm2720_vm1, %v2719_v0  ;;  %2254 = vmatprep.subr.bf16.mxu1 %v2719_v0  ;;  %p2631_p4 = pnand %p2630_p7, %p2624_p0 }
  0xb5   : > { %2239 = vmatmul.mubr.msk.bf16.vlgmr.msra.gmra.mrb[8].mxu0 %vm387_vm0, %v400_v19  ;;  %2245 = vmatmul.mubr.msk.bf16.vlgmr.msra.gmra.mrb[8].mxu1 %vm387_vm0, %v401_v20  ;;  %v3188_v19 = vld [vmem:[#allocation2 + $0x20] sm:$0xff]  ;;  %v3190_v20 = vld [vmem:[#allocation2 + $0x28] sm:$0xff] }
  0xb6   : > { %2249 = vmatpush3.bf16.xpose.msra.mxu0 %v701_v21  ;;  %2255 = vmatpush3.bf16.xpose.msra.mxu1 %v747_v22  ;;  %v412_v22 = vld [vmem:[%s3013_s22] sm:$0xf] }
  0xb7   : > { %2250 = vmatprep.mubr.msk.bf16.mxu0 %vm2720_vm1, %v2719_v0  ;;  %2256 = vmatprep.mubr.msk.bf16.mxu1 %vm2720_vm1, %v2719_v0  ;;  %v1044_v25 = vsel %vm1042_vm4, %v412_v22, 0 }
  0xb8   : > { %2260 = vmatprep.subr.bf16.mxu0 %v2719_v0  ;;  %2266 = vmatprep.subr.bf16.mxu1 %v2719_v0 }
  0xbd   : > { %2251 = vmatmul.mubr.msk.bf16.vlgmr.msra.gmra.mrb[12].mxu0 %vm387_vm0, %v402_v23  ;;  %2257 = vmatmul.mubr.msk.bf16.vlgmr.msra.gmra.mrb[12].mxu1 %vm387_vm0, %v403_v24 }
  0xbe   : > { %2262 = vmatprep.mubr.msk.bf16.mxu0 %vm2720_vm1, %v2719_v0  ;;  %2268 = vmatprep.mubr.msk.bf16.mxu1 %vm2720_vm1, %v2719_v0 }
  0xbf   : > { %2261 = vmatpush3.bf16.msra.mxu0 %v1044_v25 }
  0xc0   : > { %2272 = vmatprep.subr.bf16.mxu0 %v2719_v0 }
 0x178   : > { %v3121_v26 = vpop.f32.mrb[0].mxu0  ;;  %v3123_v27 = vpop.f32.mrb[0].mxu1 }
 0x179   : > { %v2216_v28 = vpop.f32.mrb[1].mxu0  ;;  %v798_v29 = vsel %vm797_vm3, %v3121_v26, -inf  ;;  %v2222_v30 = vpop.f32.mrb[1].mxu1  ;;  %v801_v35 = vsel %vm797_vm3, %v3123_v27, -inf }
 0x17a   : > { %799 = vmax.xlane.f32.xlu0 %v798_v29  ;;  %v464_v31 = vpop.f32.mrb[2].mxu0  ;;  %v510_v32 = vpop.f32.mrb[2].mxu1 }
 0x17b   : > { %v2217_v33 = vpop.f32.mrb[3].mxu0  ;;  %v2223_v34 = vpop.f32.mrb[3].mxu1  ;;  %v413_v32 = vld [vmem:[%s3013_s22 + $0x4] sm:$0xf] }
 0x17c   : > { %v1090_v33 = vsel %vm1042_vm4, %v413_v32, 0  ;;  %v3217_v34 = vld [vmem:[#allocation2 + $0x30] sm:$0xff] }
 0x17d   : > { %2267 = vmatpush3.bf16.msra.mxu1 %v1090_v33 }
 0x17e   : > { %802 = vmax.xlane.f32.xlu0 %v801_v35  ;;  %v3219_v35 = vld [vmem:[#allocation2 + $0x38] sm:$0xff]  ;;  %2278 = vmatprep.subr.bf16.mxu1 %v2719_v0 }
 0x180   : > { %v3129_v36 = vpop.f32.mrb[4].mxu0  ;;  %v3131_v37 = vpop.f32.mrb[4].mxu1 }
 0x181   : > { %v2228_v38 = vpop.f32.mrb[5].mxu0  ;;  %v804_v39 = vsel %vm797_vm3, %v3129_v36, -inf  ;;  %v2234_v40 = vpop.f32.mrb[5].mxu1  ;;  %v807_v45 = vsel %vm797_vm3, %v3131_v37, -inf }
 0x182   : > { %805 = vmax.xlane.f32.xlu1 %v804_v39  ;;  %v556_v41 = vpop.f32.mrb[6].mxu0  ;;  %v602_v42 = vpop.f32.mrb[6].mxu1 }
 0x183   : > { %v2229_v43 = vpop.f32.mrb[7].mxu0  ;;  %v2235_v44 = vpop.f32.mrb[7].mxu1 }
 0x186   : > { %808 = vmax.xlane.f32.xlu1 %v807_v45 }
 0x188   : > { %v3137_v46 = vpop.f32.mrb[8].mxu0  ;;  %v3139_v47 = vpop.f32.mrb[8].mxu1 }
 0x189   : > { %v2240_v48 = vpop.f32.mrb[9].mxu0  ;;  %v810_v49 = vsel %vm797_vm3, %v3137_v46, -inf  ;;  %v2246_v50 = vpop.f32.mrb[9].mxu1  ;;  %v813_v51 = vsel %vm797_vm3, %v3139_v47, -inf }
 0x18a   : > { %811 = vmax.xlane.f32.xlu0 %v810_v49  ;;  %v648_v53 = vpop.f32.mrb[10].mxu0  ;;  %v694_v54 = vpop.f32.mrb[10].mxu1  ;;  %814 = vmax.xlane.f32.xlu1 %v813_v51 }
 0x18b   : > { %v2241_v55 = vpop.f32.mrb[11].mxu0  ;;  %v2247_v56 = vpop.f32.mrb[11].mxu1 }
 0x190   : > { %v3145_v57 = vpop.f32.mrb[12].mxu0  ;;  %v3147_v58 = vpop.f32.mrb[12].mxu1 }
 0x191   : > { %v2252_v59 = vpop.f32.mrb[13].mxu0  ;;  %v816_v60 = vsel %vm797_vm3, %v3145_v57, -inf  ;;  %v2258_v61 = vpop.f32.mrb[13].mxu1  ;;  %v819_v62 = vsel %vm797_vm3, %v3147_v58, -inf }
 0x192   : > { %817 = vmax.xlane.f32.xlu0 %v816_v60  ;;  %v740_v63 = vpop.f32.mrb[14].mxu0  ;;  %v786_v1 = vpop.f32.mrb[14].mxu1  ;;  %820 = vmax.xlane.f32.xlu1 %v819_v62  ;;  %v414_v59 = vld [vmem:[%s3013_s22 + $0x8] sm:$0xf] }
 0x193   : > { %v2253_v2 = vpop.f32.mrb[15].mxu0  ;;  %v2259_v3 = vpop.f32.mrb[15].mxu1 }
 0x207   : > { %v800_v5 = vpop.xlane.xlu0 %799 }
 0x208   : > { %v3156_v6 = vmax.f32 %v3153_v4, %v800_v5 }
 0x20a   : > { %v830_v8 = vsub.f32 %v3153_v4, %v3156_v6  ;;  %1424 = vst.msk [vmem:[#allocation2] sm:$0xff] %vm370_vm2, %v3156_v6  ;;  %856 = vperm.xlu0 %2445, %v3156_v6   ;;  %v2447_v4 = vld [vmem:[#allocation11] sm:$0xff]  }
 0x20b   : > { %v803_v9 = vpop.xlane.xlu0 %802  ;;  %v918_v6 = vld [vmem:[#allocation3] sm:$0xff] }
 0x20c   : > { %v3166_v10 = vmax.f32 %v3158_v7, %v803_v9 }
 0x20e   : > { %v831_v12 = vsub.f32 %v3158_v7, %v3166_v10  ;;  %1425 = vst.msk [vmem:[#allocation2 + $0x8] sm:$0xff] %vm370_vm2, %v3166_v10  ;;  %861 = vperm.xlu1 %2446, %v3166_v10  }
 0x20f   : > { %v806_v13 = vpop.xlane.xlu1 %805 }
 0x210   : > { %v3176_v14 = vmax.f32 %v3168_v11, %v806_v13 }
 0x212   : > { %v832_v16 = vsub.f32 %v3168_v11, %v3176_v14  ;;  %1426 = vst.msk [vmem:[#allocation2 + $0x10] sm:$0xff] %vm370_vm2, %v3176_v14  ;;  %866 = vperm.xlu1 %2446, %v3176_v14  }
 0x213   : > { %v809_v17 = vpop.xlane.xlu1 %808 }
 0x214   : > { %v3186_v18 = vmax.f32 %v3178_v15, %v809_v17  ;;  %v416_v17 = vld [vmem:[%s3013_s22 + $0x10] sm:$0xf] }
 0x215   : > { %v1228_v33 = vsel %vm1042_vm4, %v416_v17, 0  ;;  %v920_v17 = vld [vmem:[#allocation3 + $0x10] sm:$0xff] }
 0x216   : > { %v833_v21 = vsub.f32 %v3178_v15, %v3186_v18  ;;  %1427 = vst.msk [vmem:[#allocation2 + $0x18] sm:$0xff] %vm370_vm2, %v3186_v18  ;;  %871 = vperm.xlu1 %2446, %v3186_v18   ;;  %v919_v15 = vld [vmem:[#allocation3 + $0x8] sm:$0xff] }
 0x217   : > { %v812_v23 = vpop.xlane.xlu0 %811  ;;  %v815_v24 = vpop.xlane.xlu1 %814 }
 0x218   : > { %v3200_v28 = vmax.f32 %v3188_v19, %v812_v23  ;;  %v3203_v29 = vmax.f32 %v3190_v20, %v815_v24 }
 0x21a   : > { %v834_v30 = vsub.f32 %v3188_v19, %v3200_v28  ;;  %1428 = vst.msk [vmem:[#allocation2 + $0x20] sm:$0xff] %vm370_vm2, %v3200_v28  ;;  %876 = vperm.xlu1 %2446, %v3200_v28   ;;  %v835_v31 = vsub.f32 %v3190_v20, %v3203_v29  ;;  %1429 = vst.msk [vmem:[#allocation2 + $0x28] sm:$0xff] %vm370_vm2, %v3203_v29 }
 0x21c   : > { %v848_v18 = vmul.f32 1.442695, %v835_v31 }
 0x21e   : > { %881 = vperm.xlu1 %2446, %v3203_v29  }
 0x21f   : > { %v818_v38 = vpop.xlane.xlu0 %817  ;;  %v821_v39 = vpop.xlane.xlu1 %820 }
 0x220   : > { %v3224_v40 = vmax.f32 %v3217_v34, %v818_v38  ;;  %v3227_v41 = vmax.f32 %v3219_v35, %v821_v39  ;;  %v417_v38 = vld [vmem:[%s3013_s22 + $0x14] sm:$0xf] }
 0x222   : > { %v836_v42 = vsub.f32 %v3217_v34, %v3224_v40  ;;  %1430 = vst.msk [vmem:[#allocation2 + $0x30] sm:$0xff] %vm370_vm2, %v3224_v40  ;;  %886 = vperm.xlu1 %2446, %v3224_v40   ;;  %v837_v43 = vsub.f32 %v3219_v35, %v3227_v41  ;;  %1431 = vst.msk [vmem:[#allocation2 + $0x38] sm:$0xff] %vm370_vm2, %v3227_v41  ;;  %v922_v34 = vld [vmem:[#allocation3 + $0x20] sm:$0xff] }
 0x224   : > { %v850_v19 = vmul.f32 1.442695, %v836_v42  ;;  %v852_v20 = vmul.f32 1.442695, %v837_v43 }
 0x226   : > { %891 = vperm.xlu1 %2446, %v3227_v41  }
 0x289   : > { %v857_v44 = vpop.permute.xlu0 %856 }
 0x28a   : > { %v894_v45 = vsub.f32 %v3121_v26, %v857_v44 }
 0x28c   : > { %v902_v48 = vmul.f32 1.442695, %v894_v45 }
 0x28d   : > { %v862_v49 = vpop.permute.xlu1 %861 }
 0x28e   : > { %2455 = vpow2.f32 %v902_v48  ;;  %v895_v50 = vsub.f32 %v3123_v27, %v862_v49  ;;  %v1136_v27 = vsel %vm1042_vm4, %v414_v59, 0 }
 0x290   : > { %v904_v51 = vmul.f32 1.442695, %v895_v50  ;;  %v1274_v50 = vsel %vm1042_vm4, %v417_v38, 0 }
 0x291   : > { %v867_v52 = vpop.permute.xlu1 %866 }
 0x292   : > { %2457 = vpow2.f32 %v904_v51  ;;  %v896_v53 = vsub.f32 %v3129_v36, %v867_v52  ;;  %v415_v36 = vld [vmem:[%s3013_s22 + $0xc] sm:$0xf]  ;;  %v418_v51 = vld [vmem:[%s3013_s22 + $0x18] sm:$0xf] }
 0x293   : > { %v1182_v13 = vsel %vm1042_vm4, %v415_v36, 0 }
 0x294   : > { %v906_v54 = vmul.f32 1.442695, %v896_v53 }
 0x295   : > { %v872_v55 = vpop.permute.xlu1 %871 }
 0x296   : > { %2459 = vpow2.f32 %v906_v54  ;;  %v897_v56 = vsub.f32 %v3131_v37, %v872_v55 }
 0x298   : > { %v2456_v60 = vpop.eup %2455  ;;  %v908_v61 = vmul.f32 1.442695, %v897_v56  ;;  %v1320_v56 = vsel %vm1042_vm4, %v418_v51, 0 }
 0x299   : > { %v877_v26 = vpop.permute.xlu1 %876  ;;  %v934_v62 = vsel %vm797_vm3, %v2456_v60, 0.0  ;;  %v1031_v63 = vpack.c.bf16 %v2456_v60, %v2456_v60 }
 0x29a   : > { %2461 = vpow2.f32 %v908_v61  ;;  %v898_v1 = vsub.f32 %v3137_v46, %v877_v26  ;;  %935 = vadd.xlane.f32.xlu1 %v934_v62 }
 0x29b   : > { %2263 = vmatmul.mubr.msk.bf16.vlgmr.msra.gmra.mrb[16].mxu0 %vm797_vm3, %v1031_v63 }
 0x29c   : > { %v2458_v2 = vpop.eup %2457  ;;  %v910_v3 = vmul.f32 1.442695, %v898_v1  ;;  %2273 = vmatpush3.bf16.msra.mxu0 %v1136_v27  ;;  %2274 = vmatprep.mubr.msk.bf16.mxu0 %vm2720_vm1, %v2719_v0 }
 0x29d   : > { %v882_v37 = vpop.permute.xlu1 %881  ;;  %v937_v5 = vsel %vm797_vm3, %v2458_v2, 0.0  ;;  %v1032_v9 = vpack.c.bf16 %v2458_v2, %v2458_v2  ;;  %2284 = vmatprep.subr.bf16.mxu0 %v2719_v0 }
 0x29e   : > { %2463 = vpow2.f32 %v910_v3  ;;  %v899_v46 = vsub.f32 %v3139_v47, %v882_v37  ;;  %938 = vadd.xlane.f32.xlu0 %v937_v5  ;;  %v840_v3 = vmul.f32 1.442695, %v831_v12  ;;  %v838_v37 = vmul.f32 1.442695, %v830_v8 }
 0x29f   : > { %2269 = vmatmul.mubr.msk.bf16.vlgmr.msra.gmra.mrb[16].mxu1 %vm797_vm3, %v1032_v9  ;;  %v842_v5 = vmul.f32 1.442695, %v832_v16  ;;  %v844_v9 = vmul.f32 1.442695, %v833_v21  ;;  %v846_v8 = vmul.f32 1.442695, %v834_v30 }
 0x2a0   : > { %v2460_v22 = vpop.eup %2459  ;;  %v912_v23 = vmul.f32 1.442695, %v899_v46  ;;  %2279 = vmatpush3.bf16.msra.mxu1 %v1182_v13  ;;  %2280 = vmatprep.mubr.msk.bf16.mxu1 %vm2720_vm1, %v2719_v0 }
 0x2a1   : > { %v887_v24 = vpop.permute.xlu1 %886  ;;  %v940_v25 = vsel %vm797_vm3, %v2460_v22, 0.0  ;;  %v1033_v32 = vpack.c.bf16 %v2460_v22, %v2460_v22  ;;  %2290 = vmatprep.subr.bf16.mxu1 %v2719_v0 }
 0x2a2   : > { %2465 = vpow2.f32 %v912_v23  ;;  %v900_v47 = vsub.f32 %v3145_v57, %v887_v24  ;;  %941 = vadd.xlane.f32.xlu0 %v940_v25  ;;  %v921_v23 = vld [vmem:[#allocation3 + $0x18] sm:$0xff] }
 0x2a3   : > { %2275 = vmatmul.mubr.msk.bf16.vlgmr.msra.gmra.mrb[20].mxu0 %vm797_vm3, %v1033_v32 }
 0x2a4   : > { %v2462_v39 = vpop.eup %2461  ;;  %v914_v44 = vmul.f32 1.442695, %v900_v47  ;;  %2285 = vmatpush3.bf16.msra.mxu0 %v1228_v33  ;;  %2286 = vmatprep.mubr.msk.bf16.mxu0 %vm2720_vm1, %v2719_v0 }
 0x2a5   : > { %v892_v45 = vpop.permute.xlu1 %891  ;;  %v943_v48 = vsel %vm797_vm3, %v2462_v39, 0.0  ;;  %v1034_v49 = vpack.c.bf16 %v2462_v39, %v2462_v39  ;;  %2296 = vmatprep.subr.bf16.mxu0 %v2719_v0  ;;  %v923_v39 = vld [vmem:[#allocation3 + $0x28] sm:$0xff] }
 0x2a6   : > { %2467 = vpow2.f32 %v914_v44  ;;  %v901_v57 = vsub.f32 %v3147_v58, %v892_v45  ;;  %944 = vadd.xlane.f32.xlu1 %v943_v48  ;;  %v419_v58 = vld [vmem:[%s3013_s22 + $0x1c] sm:$0xf]  ;;  %v924_v48 = vld [vmem:[#allocation3 + $0x30] sm:$0xff] }
 0x2a7   : > { %2281 = vmatmul.mubr.msk.bf16.vlgmr.msra.gmra.mrb[20].mxu1 %vm797_vm3, %v1034_v49  ;;  %v1366_v26 = vsel %vm1042_vm4, %v419_v58, 0 }
 0x2a8   : > { %v2464_v52 = vpop.eup %2463  ;;  %v916_v53 = vmul.f32 1.442695, %v901_v57  ;;  %2291 = vmatpush3.bf16.msra.mxu1 %v1274_v50  ;;  %2292 = vmatprep.mubr.msk.bf16.mxu1 %vm2720_vm1, %v2719_v0 }
 0x2a9   : > { %v946_v54 = vsel %vm797_vm3, %v2464_v52, 0.0  ;;  %v1035_v55 = vpack.c.bf16 %v2464_v52, %v2464_v52  ;;  %2302 = vmatprep.subr.bf16.mxu1 %v2719_v0 }
 0x2aa   : > { %2469 = vpow2.f32 %v916_v53  ;;  %947 = vadd.xlane.f32.xlu0 %v946_v54  ;;  %v925_v54 = vld [vmem:[#allocation3 + $0x38] sm:$0xff] }
 0x2ab   : > { %2287 = vmatmul.mubr.msk.bf16.vlgmr.msra.gmra.mrb[24].mxu0 %vm797_vm3, %v1035_v55  ;;  %2471 = vpow2.f32 %v840_v3  ;;  %v2448_v55 = vld [vmem:[#allocation11 + $0x8] sm:$0xff]  }
 0x2ac   : > { %v2466_v59 = vpop.eup %2465  ;;  %2297 = vmatpush3.bf16.msra.mxu0 %v1320_v56  ;;  %2298 = vmatprep.mubr.msk.bf16.mxu0 %vm2720_vm1, %v2719_v0  ;;  %2473 = vpow2.f32 %v838_v37 }
 0x2ad   : > { %v949_v60 = vsel %vm797_vm3, %v2466_v59, 0.0  ;;  %v1036_v61 = vpack.c.bf16 %v2466_v59, %v2466_v59  ;;  %2308 = vmatprep.subr.bf16.mxu0 %v2719_v0  ;;  %2475 = vpow2.f32 %v842_v5 }
 0x2ae   : > { %950 = vadd.xlane.f32.xlu1 %v949_v60  ;;  %2477 = vpow2.f32 %v844_v9  ;;  %v975_v9 = vld [vmem:[#allocation4] sm:$0xff] }
 0x2af   : > { %2293 = vmatmul.mubr.msk.bf16.vlgmr.msra.gmra.mrb[24].mxu1 %vm797_vm3, %v1036_v61  ;;  %2479 = vpow2.f32 %v846_v8 }
 0x2b0   : > { %v2468_v62 = vpop.eup %2467  ;;  %2303 = vmatpush3.bf16.msra.mxu1 %v1366_v26  ;;  %2304 = vmatprep.mubr.msk.bf16.mxu1 %vm2720_vm1, %v2719_v0  ;;  %2481 = vpow2.f32 %v848_v18 }
 0x2b1   : > { %v952_v63 = vsel %vm797_vm3, %v2468_v62, 0.0  ;;  %v1037_v27 = vpack.c.bf16 %v2468_v62, %v2468_v62  ;;  %2314 = vmatprep.subr.bf16.mxu1 %v2719_v0  ;;  %2483 = vpow2.f32 %v850_v19 }
 0x2b2   : > { %953 = vadd.xlane.f32.xlu0 %v952_v63 }
 0x2b3   : > { %2299 = vmatmul.mubr.msk.bf16.vlgmr.msra.gmra.mrb[28].mxu0 %vm797_vm3, %v1037_v27 }
 0x2b4   : > { %v2470_v1 = vpop.eup %2469  ;;  %2310 = vmatprep.mubr.msk.bf16.mxu0 %vm2720_vm1, %v2719_v0  ;;  %2309 = vmatpush3.bf16.msra.mxu0 %v2447_v4 }
 0x2b5   : > { %v955_v36 = vsel %vm797_vm3, %v2470_v1, 0.0  ;;  %v1038_v2 = vpack.c.bf16 %v2470_v1, %v2470_v1  ;;  %v2472_v7 = vpop.eup %2471  ;;  %2320 = vmatprep.subr.bf16.mxu0 %v2719_v0 }
 0x2b6   : > { %956 = vadd.xlane.f32.xlu1 %v955_v36  ;;  %v2474_v10 = vpop.eup %2473  ;;  %v927_v21 = vmul.f32 %v2472_v7, %v919_v15 }
 0x2b7   : > { %2305 = vmatmul.mubr.msk.bf16.vlgmr.msra.gmra.mrb[28].mxu1 %vm797_vm3, %v1038_v2  ;;  %v2476_v12 = vpop.eup %2475  ;;  %v926_v11 = vmul.f32 %v2474_v10, %v918_v6 }
 0x2b8   : > { %2316 = vmatprep.mubr.msk.bf16.mxu1 %vm2720_vm1, %v2719_v0  ;;  %v2478_v13 = vpop.eup %2477  ;;  %v928_v28 = vmul.f32 %v2476_v12, %v920_v17  ;;  %2315 = vmatpush3.bf16.msra.mxu1 %v2448_v55 }
 0x2b9   : > { %v929_v31 = vmul.f32 %v2478_v13, %v921_v23  ;;  %v2480_v25 = vpop.eup %2479  ;;  %2326 = vmatprep.subr.bf16.mxu1 %v2719_v0 }
 0x2ba   : > { %v930_v33 = vmul.f32 %v2480_v25, %v922_v34  ;;  %v2482_v47 = vpop.eup %2481 }
 0x2bb   : > { %v931_v43 = vmul.f32 %v2482_v47, %v923_v39  ;;  %v2484_v44 = vpop.eup %2483 }
 0x2bc   : > { %v932_v51 = vmul.f32 %v2484_v44, %v924_v48 }
 0x2c7   : > { %990 = vperm.xlu1 %2446, %v2472_v7  }
 0x2c8   : > { %985 = vperm.xlu0 %2445, %v2474_v10  }
 0x2cb   : > { %995 = vperm.xlu1 %2446, %v2476_v12  }
 0x2cc   : > { %1000 = vperm.xlu0 %2445, %v2478_v13   ;;  %v976_v13 = vld [vmem:[#allocation4 + $0x8] sm:$0xff] }
 0x327   : > { %v936_v14 = vpop.xlane.xlu1 %935 }
 0x328   : > { %v958_v16 = vadd.f32 %v936_v14, %v926_v11 }
 0x32a   : > { %967 = vst.msk [vmem:[#allocation3] sm:$0xff] %vm370_vm2, %v958_v16  ;;  %v977_v16 = vld [vmem:[#allocation4 + $0x10] sm:$0xff] }
 0x32b   : > { %v939_v46 = vpop.xlane.xlu0 %938 }
 0x32c   : > { %v959_v22 = vadd.f32 %v939_v46, %v927_v21 }
 0x32e   : > { %968 = vst.msk [vmem:[#allocation3 + $0x8] sm:$0xff] %vm370_vm2, %v959_v22 }
 0x32f   : > { %v942_v30 = vpop.xlane.xlu0 %941 }
 0x330   : > { %v960_v24 = vadd.f32 %v942_v30, %v928_v28  ;;  %v978_v30 = vld [vmem:[#allocation4 + $0x18] sm:$0xff] }
 0x331   : > { %v1443_v29 = vld [vmem:[#allocation3] sm:$0xff] }
 0x332   : > { %969 = vst.msk [vmem:[#allocation3 + $0x10] sm:$0xff] %vm370_vm2, %v960_v24  ;;  %2485 = vrcp.f32 %v1443_v29 }
 0x333   : > { %v945_v32 = vpop.xlane.xlu1 %944  ;;  %2487 = vpow2.f32 %v852_v20 }
 0x334   : > { %v961_v40 = vadd.f32 %v945_v32, %v929_v31 }
 0x335   : > { %v1444_v42 = vld [vmem:[#allocation3 + $0x8] sm:$0xff] }
 0x336   : > { %970 = vst.msk [vmem:[#allocation3 + $0x18] sm:$0xff] %vm370_vm2, %v961_v40  ;;  %2489 = vrcp.f32 %v1444_v42 }
 0x337   : > { %v948_v38 = vpop.xlane.xlu0 %947 }
 0x338   : > { %v962_v35 = vadd.f32 %v948_v38, %v930_v33 }
 0x339   : > { %v1445_v41 = vld [vmem:[#allocation3 + $0x10] sm:$0xff] }
 0x33a   : > { %971 = vst.msk [vmem:[#allocation3 + $0x20] sm:$0xff] %vm370_vm2, %v962_v35  ;;  %2491 = vrcp.f32 %v1445_v41 }
 0x33b   : > { %v951_v45 = vpop.xlane.xlu1 %950 }
 0x33c   : > { %v2486_v49 = vpop.eup %2485  ;;  %v963_v50 = vadd.f32 %v951_v45, %v931_v43 }
 0x33d   : > { %1461 = vperm.xlu1 %2446, %v2486_v49   ;;  %v1446_v57 = vld [vmem:[#allocation3 + $0x18] sm:$0xff]  ;;  %v2488_v52 = vpop.eup %2487 }
 0x33e   : > { %972 = vst.msk [vmem:[#allocation3 + $0x28] sm:$0xff] %vm370_vm2, %v963_v50  ;;  %2493 = vrcp.f32 %v1446_v57  ;;  %v933_v60 = vmul.f32 %v2488_v52, %v925_v54 }
 0x33f   : > { %v954_v53 = vpop.xlane.xlu0 %953 }
 0x340   : > { %v2490_v56 = vpop.eup %2489  ;;  %v964_v58 = vadd.f32 %v954_v53, %v932_v51 }
 0x341   : > { %1466 = vperm.xlu0 %2445, %v2490_v56   ;;  %1005 = vperm.xlu1 %2446, %v2480_v25   ;;  %v1447_v59 = vld [vmem:[#allocation3 + $0x20] sm:$0xff] }
 0x342   : > { %973 = vst.msk [vmem:[#allocation3 + $0x30] sm:$0xff] %vm370_vm2, %v964_v58  ;;  %2495 = vrcp.f32 %v1447_v59 }
 0x343   : > { %v957_v61 = vpop.xlane.xlu1 %956 }
 0x344   : > { %v2492_v26 = vpop.eup %2491  ;;  %v965_v62 = vadd.f32 %v957_v61, %v933_v60  ;;  %v979_v60 = vld [vmem:[#allocation4 + $0x20] sm:$0xff]  ;;  %v2449_v61 = vld [vmem:[#allocation11 + $0x10] sm:$0xff]  }
 0x345   : > { %1010 = vperm.xlu0 %2445, %v2482_v47   ;;  %1471 = vperm.xlu1 %2446, %v2492_v26   ;;  %v1448_v63 = vld [vmem:[#allocation3 + $0x28] sm:$0xff] }
 0x346   : > { %974 = vst.msk [vmem:[#allocation3 + $0x38] sm:$0xff] %vm370_vm2, %v965_v62  ;;  %2497 = vrcp.f32 %v1448_v63 }
 0x347   : > { %v986_v7 = vpop.permute.xlu0 %985  ;;  %v991_v10 = vpop.permute.xlu1 %990 }
 0x348   : > { %v2494_v27 = vpop.eup %2493  ;;  %v1023_v12 = vmul.f32 %v986_v7, %v975_v9  ;;  %v1024_v14 = vmul.f32 %v991_v10, %v976_v13 }
 0x349   : > { %1476 = vperm.xlu0 %2445, %v2494_v27   ;;  %1015 = vperm.xlu1 %2446, %v2484_v44   ;;  %v1449_v1 = vld [vmem:[#allocation3 + $0x30] sm:$0xff] }
 0x34a   : > { %2499 = vrcp.f32 %v1449_v1 }
 0x34b   : > { %v996_v18 = vpop.permute.xlu1 %995  ;;  %v1001_v23 = vpop.permute.xlu0 %1000 }
 0x34c   : > { %v2496_v36 = vpop.eup %2495  ;;  %v1025_v19 = vmul.f32 %v996_v18, %v977_v16  ;;  %v1026_v25 = vmul.f32 %v1001_v23, %v978_v30 }
 0x34d   : > { %1020 = vperm.xlu0 %2445, %v2488_v52   ;;  %1481 = vperm.xlu1 %2446, %v2496_v36   ;;  %v1450_v2 = vld [vmem:[#allocation3 + $0x38] sm:$0xff] }
 0x34e   : > { %2501 = vrcp.f32 %v1450_v2  ;;  %v980_v2 = vld [vmem:[#allocation4 + $0x28] sm:$0xff] }
 0x350   : > { %v2498_v3 = vpop.eup %2497 }
 0x351   : > { %1486 = vperm.xlu0 %2445, %v2498_v3   ;;  %v2450_v3 = vld [vmem:[#allocation11 + $0x18] sm:$0xff]  }
 0x354   : > { %v2500_v37 = vpop.eup %2499 }
 0x355   : > { %1491 = vperm.xlu1 %2446, %v2500_v37  }
 0x358   : > { %v2502_v5 = vpop.eup %2501 }
 0x359   : > { %1496 = vperm.xlu0 %2445, %v2502_v5  }
 0x36e   : > { %v1080_v4 = vpop.f32.mrb[16].mxu0 }
 0x36f   : > { %v1408_v6 = vadd.f32 %v1080_v4, %v1023_v12  ;;  %v2264_v8 = vpop.f32.mrb[17].mxu0  ;;  %v981_v4 = vld [vmem:[#allocation4 + $0x30] sm:$0xff] }
 0x370   : > { %v1083_v11 = vpop.f32.mrb[18].mxu0 }
 0x371   : > { %1416 = vst.msk [vmem:[#allocation4] sm:$0xff] %vm387_vm0, %v1408_v6  ;;  %v2265_v15 = vpop.f32.mrb[19].mxu0  ;;  %v2451_v6 = vld [vmem:[#allocation11 + $0x20] sm:$0xff]  }
 0x372   : > { %v1126_v21 = vpop.f32.mrb[16].mxu1 }
 0x373   : > { %v1409_v46 = vadd.f32 %v1126_v21, %v1024_v14  ;;  %v2270_v17 = vpop.f32.mrb[17].mxu1 }
 0x374   : > { %v1129_v22 = vpop.f32.mrb[18].mxu1  ;;  %v2452_v17 = vld [vmem:[#allocation11 + $0x28] sm:$0xff]  }
 0x375   : > { %1417 = vst.msk [vmem:[#allocation4 + $0x8] sm:$0xff] %vm387_vm0, %v1409_v46  ;;  %v2271_v28 = vpop.f32.mrb[19].mxu1  ;;  %v982_v46 = vld [vmem:[#allocation4 + $0x38] sm:$0xff] }
 0x376   : > { %v1172_v24 = vpop.f32.mrb[20].mxu0 }
 0x377   : > { %v1410_v20 = vadd.f32 %v1172_v24, %v1025_v19  ;;  %v2276_v29 = vpop.f32.mrb[21].mxu0 }
 0x378   : > { %v1175_v31 = vpop.f32.mrb[22].mxu0  ;;  %v1435_v56 = vld [vmem:[#allocation4] sm:$0xff]  ;;  %v2453_v29 = vld [vmem:[#allocation11 + $0x30] sm:$0xff]  }
 0x379   : > { %1418 = vst.msk [vmem:[#allocation4 + $0x10] sm:$0xff] %vm387_vm0, %v1410_v20  ;;  %v2277_v32 = vpop.f32.mrb[23].mxu0 }
 0x37a   : > { %v1218_v34 = vpop.f32.mrb[20].mxu1 }
 0x37b   : > { %v1411_v40 = vadd.f32 %v1218_v34, %v1026_v25  ;;  %v2282_v42 = vpop.f32.mrb[21].mxu1 }
 0x37c   : > { %v1221_v33 = vpop.f32.mrb[22].mxu1  ;;  %v1436_v62 = vld [vmem:[#allocation4 + $0x8] sm:$0xff]  ;;  %v2454_v42 = vld [vmem:[#allocation11 + $0x38] sm:$0xff]  }
 0x37d   : > { %1419 = vst.msk [vmem:[#allocation4 + $0x18] sm:$0xff] %vm387_vm0, %v1411_v40  ;;  %v2283_v47 = vpop.f32.mrb[23].mxu1 }
 0x37e   : > { %v1264_v38 = vpop.f32.mrb[24].mxu0 }
 0x37f   : > { %v2288_v39 = vpop.f32.mrb[25].mxu0 }
 0x380   : > { %v1267_v35 = vpop.f32.mrb[26].mxu0  ;;  %v1437_v7 = vld [vmem:[#allocation4 + $0x10] sm:$0xff] }
 0x381   : > { %v2289_v41 = vpop.f32.mrb[27].mxu0 }
 0x382   : > { %v1310_v43 = vpop.f32.mrb[24].mxu1 }
 0x383   : > { %v2294_v44 = vpop.f32.mrb[25].mxu1 }
 0x384   : > { %v1313_v45 = vpop.f32.mrb[26].mxu1  ;;  %v1438_v14 = vld [vmem:[#allocation4 + $0x18] sm:$0xff] }
 0x385   : > { %v2295_v48 = vpop.f32.mrb[27].mxu1 }
 0x386   : > { %v1356_v49 = vpop.f32.mrb[28].mxu0 }
 0x387   : > { %v2300_v50 = vpop.f32.mrb[29].mxu0 }
 0x388   : > { %v1359_v57 = vpop.f32.mrb[30].mxu0 }
 0x389   : > { %v2301_v51 = vpop.f32.mrb[31].mxu0 }
 0x38a   : > { %v1402_v52 = vpop.f32.mrb[28].mxu1 }
 0x38b   : > { %v2306_v53 = vpop.f32.mrb[29].mxu1 }
 0x38c   : > { %v1405_v54 = vpop.f32.mrb[30].mxu1 }
 0x38d   : > { %v2307_v55 = vpop.f32.mrb[31].mxu1 }
 0x3bc   : > { %v1462_v58 = vpop.permute.xlu1 %1461 }
 0x3bd   : > { %v1499_v59 = vmul.f32 %v1462_v58, %v1435_v56 }
 0x3bf   : > { %v1507_v26 = vpack.c.bf16 %v1499_v59, %v1499_v59 }
 0x3c0   : > { %v1467_v63 = vpop.permute.xlu0 %1466  ;;  %v1006_v27 = vpop.permute.xlu1 %1005 }
 0x3c1   : > { %v1500_v1 = vmul.f32 %v1467_v63, %v1436_v62  ;;  %v1027_v36 = vmul.f32 %v1006_v27, %v979_v60  ;;  %2311 = vmatmul.mubr.msk.bf16.vlgmr.msra.gmra.mrb[32].mxu0 %vm387_vm0, %v1507_v26 }
 0x3c2   : > { %2321 = vmatpush3.bf16.msra.mxu0 %v2449_v61  ;;  %2322 = vmatprep.mubr.msk.bf16.mxu0 %vm2720_vm1, %v2719_v0 }
 0x3c3   : > { %v1508_v37 = vpack.c.bf16 %v1500_v1, %v1500_v1  ;;  %v1412_v5 = vadd.f32 %v1264_v38, %v1027_v36  ;;  %2332 = vmatprep.subr.bf16.mxu0 %v2719_v0 }
 0x3c4   : > { %v1011_v9 = vpop.permute.xlu0 %1010  ;;  %v1472_v10 = vpop.permute.xlu1 %1471 }
 0x3c5   : > { %1420 = vst.msk [vmem:[#allocation4 + $0x20] sm:$0xff] %vm387_vm0, %v1412_v5  ;;  %v1028_v12 = vmul.f32 %v1011_v9, %v980_v2  ;;  %v1501_v13 = vmul.f32 %v1472_v10, %v1437_v7  ;;  %2317 = vmatmul.mubr.msk.bf16.vlgmr.msra.gmra.mrb[32].mxu1 %vm387_vm0, %v1508_v37 }
 0x3c6   : > { %2327 = vmatpush3.bf16.msra.mxu1 %v2450_v3  ;;  %2328 = vmatprep.mubr.msk.bf16.mxu1 %vm2720_vm1, %v2719_v0 }
 0x3c7   : > { %v1413_v8 = vadd.f32 %v1310_v43, %v1028_v12  ;;  %v1509_v11 = vpack.c.bf16 %v1501_v13, %v1501_v13  ;;  %2338 = vmatprep.subr.bf16.mxu1 %v2719_v0 }
 0x3c8   : > { %v1477_v15 = vpop.permute.xlu0 %1476  ;;  %v1016_v16 = vpop.permute.xlu1 %1015 }
 0x3c9   : > { %1421 = vst.msk [vmem:[#allocation4 + $0x28] sm:$0xff] %vm387_vm0, %v1413_v8  ;;  %v1502_v18 = vmul.f32 %v1477_v15, %v1438_v14  ;;  %v1029_v21 = vmul.f32 %v1016_v16, %v981_v4  ;;  %2323 = vmatmul.mubr.msk.bf16.vlgmr.msra.gmra.mrb[36].mxu0 %vm387_vm0, %v1509_v11 }
 0x3ca   : > { %2333 = vmatpush3.bf16.msra.mxu0 %v2451_v6  ;;  %2334 = vmatprep.mubr.msk.bf16.mxu0 %vm2720_vm1, %v2719_v0 }
 0x3cb   : > { %v1510_v22 = vpack.c.bf16 %v1502_v18, %v1502_v18  ;;  %v1414_v19 = vadd.f32 %v1356_v49, %v1029_v21  ;;  %2344 = vmatprep.subr.bf16.mxu0 %v2719_v0 }
 0x3cc   : > { %v1021_v28 = vpop.permute.xlu0 %1020  ;;  %v1439_v30 = vld [vmem:[#allocation4 + $0x20] sm:$0xff]  ;;  %v1482_v23 = vpop.permute.xlu1 %1481 }
 0x3cd   : > { %1422 = vst.msk [vmem:[#allocation4 + $0x30] sm:$0xff] %vm387_vm0, %v1414_v19  ;;  %v1030_v24 = vmul.f32 %v1021_v28, %v982_v46  ;;  %v1503_v20 = vmul.f32 %v1482_v23, %v1439_v30  ;;  %2329 = vmatmul.mubr.msk.bf16.vlgmr.msra.gmra.mrb[36].mxu1 %vm387_vm0, %v1510_v22  ;;  %v2156_v28 = vld [vmem:[%s3433_s4] ss:$0 sm:$0xff] }
 0x3ce   : > { %2339 = vmatpush3.bf16.msra.mxu1 %v2452_v17  ;;  %2340 = vmatprep.mubr.msk.bf16.mxu1 %vm2720_vm1, %v2719_v0 }
 0x3cf   : > { %v1415_v31 = vadd.f32 %v1402_v52, %v1030_v24  ;;  %v1511_v25 = vpack.c.bf16 %v1503_v20, %v1503_v20  ;;  %2350 = vmatprep.subr.bf16.mxu1 %v2719_v0 }
 0x3d0   : > { %v1440_v32 = vld [vmem:[#allocation4 + $0x28] sm:$0xff]  ;;  %v1487_v34 = vpop.permute.xlu0 %1486 }
 0x3d1   : > { %1423 = vst.msk [vmem:[#allocation4 + $0x38] sm:$0xff] %vm387_vm0, %v1415_v31  ;;  %v1504_v40 = vmul.f32 %v1487_v34, %v1440_v32  ;;  %2335 = vmatmul.mubr.msk.bf16.vlgmr.msra.gmra.mrb[40].mxu0 %vm387_vm0, %v1511_v25 }
 0x3d2   : > { %2345 = vmatpush3.bf16.msra.mxu0 %v2453_v29  ;;  %2346 = vmatprep.mubr.msk.bf16.mxu0 %vm2720_vm1, %v2719_v0 }
 0x3d3   : > { %v1512_v33 = vpack.c.bf16 %v1504_v40, %v1504_v40 }
 0x3d4   : > { %v1441_v47 = vld [vmem:[#allocation4 + $0x30] sm:$0xff]  ;;  %v1492_v38 = vpop.permute.xlu1 %1491 }
 0x3d5   : > { %v1505_v39 = vmul.f32 %v1492_v38, %v1441_v47  ;;  %2341 = vmatmul.mubr.msk.bf16.vlgmr.msra.gmra.mrb[40].mxu1 %vm387_vm0, %v1512_v33 }
 0x3d6   : > { %2351 = vmatpush3.bf16.msra.mxu1 %v2454_v42  ;;  %2352 = vmatprep.mubr.msk.bf16.mxu1 %vm2720_vm1, %v2719_v0 }
 0x3d7   : > { %v1513_v35 = vpack.c.bf16 %v1505_v39, %v1505_v39 }
 0x3d8   : > { %v1442_v41 = vld [vmem:[#allocation4 + $0x38] sm:$0xff]  ;;  %v1497_v43 = vpop.permute.xlu0 %1496 }
 0x3d9   : > { %v1506_v44 = vmul.f32 %v1497_v43, %v1442_v41  ;;  %2347 = vmatmul.mubr.msk.bf16.vlgmr.msra.gmra.mrb[44].mxu0 %vm387_vm0, %v1513_v35 }
 0x3db   : > { %v1514_v45 = vpack.c.bf16 %v1506_v44, %v1506_v44 }
 0x3dd   : > { %2353 = vmatmul.mubr.msk.bf16.vlgmr.msra.gmra.mrb[44].mxu1 %vm387_vm0, %v1514_v45 }
 0x494   : > { %v1574_v48 = vpop.f32.mrb[32].mxu0 }
 0x495   : > { %v2312_v49 = vpop.f32.mrb[33].mxu0  ;;  %v1924_v52 = vsel %vm1923_vm5, %v1574_v48, 0.0 }
 0x496   : > { %v1577_v50 = vpop.f32.mrb[34].mxu0 }
 0x497   : > { %v2313_v57 = vpop.f32.mrb[35].mxu0 }
 0x498   : > { %v1623_v51 = vpop.f32.mrb[32].mxu1 }
 0x499   : > { %v1925_v53 = vsel %vm1923_vm5, %v1623_v51, 0.0  ;;  %v2318_v0 = vpop.f32.mrb[33].mxu1 }
 0x49a   : > { %v1926_v54 = vadd.f32 %v1925_v53, %v1924_v52  ;;  %v1626_v55 = vpop.f32.mrb[34].mxu1 }
 0x49b   : > { %v2319_v56 = vpop.f32.mrb[35].mxu1 }
 0x49c   : > { %v1672_v58 = vpop.f32.mrb[36].mxu0 }
 0x49d   : > { %v1927_v59 = vsel %vm1923_vm5, %v1672_v58, 0.0  ;;  %v2324_v60 = vpop.f32.mrb[37].mxu0 }
 0x49e   : > { %v1928_v61 = vadd.f32 %v1927_v59, %v1926_v54  ;;  %v1675_v26 = vpop.f32.mrb[38].mxu0 }
 0x49f   : > { %v2325_v62 = vpop.f32.mrb[39].mxu0 }
 0x4a0   : > { %v1721_v63 = vpop.f32.mrb[36].mxu1 }
 0x4a1   : > { %v1929_v27 = vsel %vm1923_vm5, %v1721_v63, 0.0  ;;  %v2330_v1 = vpop.f32.mrb[37].mxu1 }
 0x4a2   : > { %v1930_v36 = vadd.f32 %v1929_v27, %v1928_v61  ;;  %v1724_v2 = vpop.f32.mrb[38].mxu1 }
 0x4a3   : > { %v2331_v3 = vpop.f32.mrb[39].mxu1 }
 0x4a4   : > { %v1770_v37 = vpop.f32.mrb[40].mxu0 }
 0x4a5   : > { %v1931_v5 = vsel %vm1923_vm5, %v1770_v37, 0.0  ;;  %v2336_v9 = vpop.f32.mrb[41].mxu0 }
 0x4a6   : > { %v1932_v7 = vadd.f32 %v1931_v5, %v1930_v36  ;;  %v1773_v10 = vpop.f32.mrb[42].mxu0 }
 0x4a7   : > { %v2337_v12 = vpop.f32.mrb[43].mxu0 }
 0x4a8   : > { %v1819_v13 = vpop.f32.mrb[40].mxu1 }
 0x4a9   : > { %v1933_v4 = vsel %vm1923_vm5, %v1819_v13, 0.0  ;;  %v2342_v6 = vpop.f32.mrb[41].mxu1 }
 0x4aa   : > { %v1934_v8 = vadd.f32 %v1933_v4, %v1932_v7  ;;  %v1822_v11 = vpop.f32.mrb[42].mxu1 }
 0x4ab   : > { %v2343_v14 = vpop.f32.mrb[43].mxu1 }
 0x4ac   : > { %v1868_v15 = vpop.f32.mrb[44].mxu0 }
 0x4ad   : > { %v1935_v16 = vsel %vm1923_vm5, %v1868_v15, 0.0  ;;  %v2348_v18 = vpop.f32.mrb[45].mxu0 }
 0x4ae   : > { %v1936_v21 = vadd.f32 %v1935_v16, %v1934_v8  ;;  %v1871_v46 = vpop.f32.mrb[46].mxu0 }
 0x4af   : > { %v2349_v17 = vpop.f32.mrb[47].mxu0 }
 0x4b0   : > { %v1917_v22 = vpop.f32.mrb[44].mxu1 }
 0x4b1   : > { %v1937_v19 = vsel %vm1923_vm5, %v1917_v22, 0.0  ;;  %v2354_v30 = vpop.f32.mrb[45].mxu1 }
 0x4b2   : > { %v1938_v23 = vadd.f32 %v1937_v19, %v1936_v21  ;;  %v1920_v24 = vpop.f32.mrb[46].mxu1 }
 0x4b3   : > { %v2355_v20 = vpop.f32.mrb[47].mxu1 }
 0x4b4   : > { %v1946_v29 = vadd.f32 %v2156_v28, %v1938_v23 }
 0x4b6   : > { %1947 = vst.msk [vmem:[%s364_s16] sm:$0xff] %vm1923_vm5, %v1946_v29 }
 0x4b7   : > { %2634 = shalt.err (!%p2631_p4)
}
 0x4b8   : > { %s2635_s27 = scalar_lea.hbm %s3379_s24, 128  ;;  %s2639_s1 = scalar_lea.hbm %s3434_s5, 256 }
 0x4b9   : > { %p2636_p3 = scmp.ne.s32.totalorder %s3379_s24, %s2635_s27  ;;  %p2640_p8 = scmp.lt.u32.totalorder %s3379_s24, %s3434_s5 }
 0x4ba   : > { %p2641_p12 = scmp.lt.u32.totalorder %s2639_s1, %s2635_s27  ;;  %p2643_p2 = scmp.lt.u32.totalorder %s2635_s27, %s3379_s24 }
 0x4bb   : > { %p2637_p6 = pnand %p2636_p3, %p3481_p13 }
 0x4bc   : > { %p2642_p1 = por %p2641_p12, %p2640_p8 }
 0x4bd   : > { %p2638_p9 = pneg %p2637_p6 }
 0x4be   : > { %p2644_p11 = por %p2643_p2, %p2642_p1 }
 0x4c0   : > { %p2645_p0 = pnand %p2644_p11, %p2638_p9 }
 0x4c2   : > { %2648 = shalt.err (!%p2645_p0)
}
 0x4c3   : > { %2366 = dma.vmem_to_hbm [thread:$0]  (%p3481_p13), %s3381_s9, 128, %s3379_s24, %s1949_s28  }
 0x4c4 PF: > { %s3482_s13 = sld [smem:[#allocation20_spill]]  ;;  %s1975_s7 = sand.u32 1, %s2691_s18  }
 0x4c5   : > { %p3483_p5 = scmp.ne.s32.totalorder %s3467_s12, 0  ;;  %s1976_s22 = scalar_lea.sflag [#allocation7], %s1975_s7 }
 0x4ca   : > { %p3484_p10 = scmp.ge.s32.totalorder %s3482_s13, 2 }
 0x4cc   : > { %p2383_p7 = pnand %p3484_p10, %p3483_p5 }
 0x4ce   : > { %2686 = dma.done.wait (!%p2383_p7), %s1976_s22, 128  }
 0x4cf   : > { %2688 = vsyncadd (!%p2383_p7), %s1976_s22, 4294967168  ;;  %s25_s23 = sadd.s32 1, %s3482_s13   ;;  %s3485_s25 = sld [smem:[#allocation18_spill]] }
 0x4d0   : > { %p22_p4 = scmp.ge.s32.totalorder %s25_s23, 4   ;;  %s3486_s20 = sld [smem:[#allocation22_spill]] }
 0x4d1   : > { %s3487_s21 = sld [smem:[#allocation19_spill]]  ;;  %s3488_s22 = sld [smem:[#allocation21_spill]] }
 0x4d2   : > { %s3489_s18 = smov %s2695_s19  ;;  %24 = sbr.rel (!%p22_p4) target bundleno = 12 (0xc), region = 121 }
 0x4d5   : > { %s3490_s19 = smov %s3485_s25 }
 0x4d9   :  { %1981 = vsyncpa [#allocation6], 1 }
 0x4da   :  { %1983 = vsyncpa [#allocation6 + $0x1], 1 }
 0x4db   :  { %1984 = vsyncpa [#allocation9], 1 }
 0x4dc   :  { %1986 = vsyncpa [#allocation9 + $0x1], 1 }
 0x4dd   :  { %1987 = vsyncpa [#allocation12], 1 }
 0x4de   :  { %1988 = vsyncpa [#allocation7], 1 }
 0x4df   :  { %1990 = vsyncpa [#allocation7 + $0x1], 1 }

</bundles_post_ra>
